<compile_context>
chip_gen: v6e
topology: v6e:2x2x1
jax: 0.10.0
libtpu: 0.0.40
codegen_flags: <defaults>
</compile_context>

<pallas_src>
import functools
import math

import jax
import jax.numpy as jnp
from jax import lax
from jax.experimental import pallas as pl
from jax.experimental.pallas import tpu as pltpu


# --------------------------------------------------------------------------- #
# Pallas kernel: ball query (nsample+1, drop first) + grouping + center subtract
# --------------------------------------------------------------------------- #
def _ball_group_kernel(xyz_t_ref, new_p_ref, new_t_ref, feat_ref,
                       out_xyz_ref, out_feat_ref, *, radius, nsample):
    xyz_t = xyz_t_ref[0]     # (3, N)   points, coordinate-major (lane-dense)
    new_p = new_p_ref[0]     # (TP, 3)  centers, point-major
    new_t = new_t_ref[0]     # (3, TP)  centers, coordinate-major
    feat = feat_ref[0]       # (C, N)

    N = xyz_t.shape[1]
    TP = new_p.shape[0]
    S = nsample
    f32 = jnp.float32
    bf16 = jnp.bfloat16

    # ---- pairwise squared distances (TP, N) on the VPU ----------------------
    dist2 = jnp.zeros((TP, N), f32)
    for c in range(3):
        diff = new_p[:, c:c + 1] - xyz_t[c:c + 1, :]       # (TP, N)
        dist2 = dist2 + diff * diff
    in_ball = dist2 < (radius * radius)                    # (TP, N) bool

    # ---- inclusive prefix count along N (ball-query visit order) ------------
    # bf16 0/1 operands on the MXU, exact f32 accumulation.
    row = lax.broadcasted_iota(jnp.int32, (N, N), 0)
    col = lax.broadcasted_iota(jnp.int32, (N, N), 1)
    tri = (row <= col).astype(bf16)                        # tri[m, k] = 1 if m <= k
    cnt = jnp.dot(in_ball.astype(bf16), tri,
                  preferred_element_type=f32)              # (TP, N) exact small ints

    total = cnt[:, N - 1:N]                                # (TP, 1) in-ball count
    ball_nonempty = total >= 1.0

    lane = lax.broadcasted_iota(jnp.int32, (1, N), 1)
    e0 = (lane == 0).astype(f32)                           # (1, N)  index-0 one-hot
    first_hit = (in_ball & (cnt == 1.0)).astype(f32)       # (TP, N) first in-radius pt
    pad_row = jnp.where(ball_nonempty, first_hit, e0)      # (TP, N)

    # ---- per-slot one-hot gather (unrolled 2-D loop, one matmul per slot) ---
    for s in range(S):
        # slot s of the module output = (s+2)-th in-radius point, padded.
        sel = (in_ball & (cnt == float(s + 2))).astype(f32)     # (TP, N)
        has = total >= float(s + 2)                              # (TP, 1)
        onehot = jnp.where(has, sel, pad_row)                    # (TP, N)

        g_xyz = lax.dot_general(xyz_t, onehot, (((1,), (1,)), ((), ())),
                                preferred_element_type=f32)      # (3, TP)
        g_feat = lax.dot_general(feat, onehot, (((1,), (1,)), ((), ())),
                                 preferred_element_type=f32)     # (C, TP)

        # center subtraction: plain VPU broadcast subtract on the 3 xyz rows.
        out_xyz_ref[0, :, s, :] = (g_xyz - new_t).astype(out_xyz_ref.dtype)
        out_feat_ref[0, :, s, :] = g_feat.astype(out_feat_ref.dtype)


def ball_query_and_group(xyz, new_xyz, features, *, radius, nsample):
    """Fused ball query (nsample+1 with first sample dropped) + grouping +
    center subtraction.

    Returns (grouped_xyz (B,3,P,S), grouped_feat (B,C,P,S))."""
    B, N, _ = xyz.shape
    P = new_xyz.shape[1]
    C = features.shape[1]
    S = int(nsample)

    xyz_t = jnp.transpose(xyz, (0, 2, 1))        # (B, 3, N) lane-dense slab
    new_t = jnp.transpose(new_xyz, (0, 2, 1))    # (B, 3, P) for the correction

    # Tile centers across the grid (keep TP*S lane-dense where possible).
    tp = 128 if (P % 128 == 0) else P
    grid = (B, P // tp)

    kernel = functools.partial(_ball_group_kernel,
                               radius=float(radius), nsample=S)

    # Size scoped VMEM from the actual per-step working set (clamped for v7x).
    bytes_f32 = 4
    per_step = (2 * bytes_f32 * (3 * N + C * N + 6 * tp + (3 + C) * S * tp)
                + 6 * bytes_f32 * tp * N
                + 3 * N * N)
    vmem_limit = int(min(max(2 * per_step, 32 * 1024 * 1024), 64 * 1024 * 1024))

    out_xyz, out_feat = pl.pallas_call(
        kernel,
        out_shape=(jax.ShapeDtypeStruct((B, 3, S, P), jnp.float32),
                   jax.ShapeDtypeStruct((B, C, S, P), jnp.float32)),
        grid=grid,
        in_specs=[
            pl.BlockSpec((1, 3, N), lambda b, pt: (b, 0, 0)),    # xyz_t (resident)
            pl.BlockSpec((1, tp, 3), lambda b, pt: (b, pt, 0)),  # centers (P,3)
            pl.BlockSpec((1, 3, tp), lambda b, pt: (b, 0, pt)),  # centers (3,P)
            pl.BlockSpec((1, C, N), lambda b, pt: (b, 0, 0)),    # features (resident)
        ],
        out_specs=(
            pl.BlockSpec((1, 3, S, tp), lambda b, pt: (b, 0, 0, pt)),
            pl.BlockSpec((1, C, S, tp), lambda b, pt: (b, 0, 0, pt)),
        ),
        compiler_params=pltpu.CompilerParams(
            dimension_semantics=("parallel", "parallel"),
            vmem_limit_bytes=vmem_limit),
    )(xyz_t, new_xyz, new_t, features)

    # (B, C', S, P) -> (B, C', P, S)
    grouped_xyz = jnp.transpose(out_xyz, (0, 1, 3, 2))
    grouped_feat = jnp.transpose(out_feat, (0, 1, 3, 2))
    return grouped_xyz, grouped_feat


# --------------------------------------------------------------------------- #
# Plain-JAX post-processing matching QueryAndGroupQuat.forward
# --------------------------------------------------------------------------- #
def _normalize(v, axis):
    n = jnp.sqrt(jnp.sum(v * v, axis=axis, keepdims=True))
    return v / (n + 1e-6)


def _project(p, v, axis):
    p = _normalize(p, axis)
    vert = jnp.sum(p * v, axis=axis, keepdims=True) * p
    return v - vert


def _project_one(p, axis):
    p = _normalize(p, axis)
    px = jnp.take(p, 0, axis=axis)
    py = jnp.take(p, 1, axis=axis)
    pz = jnp.take(p, 2, axis=axis)
    colinear_x = jnp.abs(px) > (1.0 - 0.001)
    r0 = jnp.where(colinear_x, -py * px, 1.0 - px * px)
    r1 = jnp.where(colinear_x, 1.0 - py * py, -px * py)
    r2 = jnp.where(colinear_x, -py * pz, -px * pz)
    ref = jnp.stack([r0, r1, r2], axis=axis)
    return _normalize(ref, axis)


def _rot_sort(p, pts):
    """Sort neighbors by angle of their projection orthogonal to p.
    p: (B,3,P,1), pts: (B,3,P,S)."""
    p = _normalize(p, 1)
    ref = _project_one(p, 1)                             # (B,3,P,1)
    projs = _normalize(_project(p, pts, 1), 1)           # (B,3,P,S)
    ref_b = jnp.broadcast_to(ref, projs.shape)
    sinus = jnp.sum(jnp.cross(ref_b, projs, axis=1) * p, axis=1, keepdims=True)
    cosinus = jnp.sum(ref_b * projs, axis=1, keepdims=True)
    angles = jnp.arctan2(sinus, cosinus)                 # (B,1,P,S)
    close = jnp.sum(projs * projs, axis=1, keepdims=True) < 1e-12
    # TODO(synk): torch breaks degenerate-projection ties with torch.rand();
    # we use a deterministic index-based fallback instead.
    fallback = jnp.broadcast_to(
        jnp.arange(angles.shape[-1], dtype=angles.dtype) * 1e-3, angles.shape)
    angles = jnp.where(close, fallback, angles)
    order = jnp.argsort(angles, axis=-1)                 # (B,1,P,S)
    order_b = jnp.broadcast_to(order, pts.shape)
    return jnp.take_along_axis(pts, order_b, axis=-1)


def _to_quat(xyz, radius):
    """(B,3,P,S) -> (B,4,P,S) quaternions."""
    dist = jnp.sqrt(jnp.sum(xyz * xyz, axis=1, keepdims=True))
    ori = xyz / (dist + 1e-6)
    theta = dist / radius * (math.pi / 2.0)
    s = jnp.cos(theta)
    v = jnp.sin(theta) * ori
    return jnp.concatenate([s, v], axis=1)


def query_and_group_quat(xyz, new_xyz, features=None, *, radius, nsample, M=8):
    """Forward pass of QueryAndGroupQuat: (B, 4*M + C, npoint, nsample)."""
    B, N, _ = xyz.shape
    if features is None:
        feats = jnp.zeros((B, 8, N), jnp.float32)
        use_features = False
    else:
        feats = features
        use_features = True

    grouped_xyz, grouped_feat = ball_query_and_group(
        xyz, new_xyz, feats, radius=radius, nsample=nsample)

    p = jnp.transpose(new_xyz, (0, 2, 1))[..., None]     # (B,3,P,1)
    grouped_xyz = _rot_sort(p, grouped_xyz)
    quat = _to_quat(grouped_xyz, radius)                 # (B,4,P,S)

    # M cyclic left-shifts along the sample axis, channel layout = c*M + m.
    rolled = [jnp.roll(quat, shift=-m, axis=-1) for m in range(M)]
    stacked = jnp.stack(rolled, axis=2)                  # (B,4,M,P,S)
    Bq, _, _, P, S = stacked.shape
    new_features = stacked.reshape(Bq, 4 * M, P, S)

    if use_features:
        new_features = jnp.concatenate([new_features, grouped_feat], axis=1)
    return new_features


# --------------------------------------------------------------------------- #
# Pure-JAX reference for the kernel part (ball query + group + center subtract)
# --------------------------------------------------------------------------- #
def _reference_group(xyz, new_xyz, features, *, radius, nsample):
    B, N, _ = xyz.shape
    P = new_xyz.shape[1]

    dist2 = jnp.zeros((B, P, N), jnp.float32)
    for c in range(3):
        diff = new_xyz[:, :, None, c] - xyz[:, None, :, c]
        dist2 = dist2 + diff * diff
    mask = dist2 < radius * radius                       # (B,P,N)
    cnt = jnp.cumsum(mask.astype(jnp.int32), axis=-1)

    k_ids = jnp.arange(N)
    first_idx = jnp.sum(jnp.where(mask & (cnt == 1), k_ids, 0), axis=-1)  # (B,P)
    idx_slots = []
    for s in range(nsample):
        sel = mask & (cnt == s + 2)
        idx_s = jnp.sum(jnp.where(sel, k_ids, 0), axis=-1)
        has = jnp.any(sel, axis=-1)
        idx_slots.append(jnp.where(has, idx_s, first_idx))
    idx = jnp.stack(idx_slots, axis=-1)                  # (B,P,S)

    def gather(slab_b, idx_b):                           # slab (C,N), idx (P,S)
        return slab_b[:, idx_b]                          # (C,P,S)

    gx = jax.vmap(gather)(jnp.transpose(xyz, (0, 2, 1)), idx)    # (B,3,P,S)
    gx = gx - jnp.transpose(new_xyz, (0, 2, 1))[..., None]
    gf = jax.vmap(gather)(features, idx)                          # (B,C,P,S)
    return gx, gf


if __name__ == "__main__":
    B, N, P, S, C = 2, 64, 16, 8, 4
    radius = 0.35
    M = 8

    key = jax.random.PRNGKey(0)
    k_xyz, k_feat = jax.random.split(key)
    xyz = jax.random.uniform(k_xyz, (B, N, 3), dtype=jnp.float32)
    new_xyz = xyz[:, :P, :]                              # centroids are a subset of points
    features = jax.random.normal(k_feat, (B, C, N), dtype=jnp.float32)

    # 1) validate the Pallas kernel (ball query + grouping + center subtract)
    gx, gf = ball_query_and_group(xyz, new_xyz, features, radius=radius, nsample=S)
    gx, gf = jax.block_until_ready((gx, gf))
    rx, rf = _reference_group(xyz, new_xyz, features, radius=radius, nsample=S)
    assert gx.shape == (B, 3, P, S) and gf.shape == (B, C, P, S), (gx.shape, gf.shape)
    assert jnp.allclose(gx, rx, atol=1e-4, rtol=1e-4), float(jnp.max(jnp.abs(gx - rx)))
    assert jnp.allclose(gf, rf, atol=1e-4, rtol=1e-4), float(jnp.max(jnp.abs(gf - rf)))

    # 2) full QueryAndGroupQuat forward
    out = query_and_group_quat(xyz, new_xyz, features, radius=radius, nsample=S, M=M)
    out = jax.block_until_ready(out)
    assert out.shape == (B, 4 * M + C, P, S), out.shape
    assert bool(jnp.all(jnp.isfinite(out)))

    print("KERNEL_OK")
</pallas_src>

<mosaic_0001>
module attributes {stable_mosaic.version = 11 : i64} {
  func.func @_ball_group_kernel(%arg0: i32, %arg1: i32, %arg2: memref<1x3x64xf32, #tpu.memory_space<vmem>>, %arg3: memref<1x16x3xf32, #tpu.memory_space<vmem>>, %arg4: memref<1x3x16xf32, #tpu.memory_space<vmem>>, %arg5: memref<1x4x64xf32, #tpu.memory_space<vmem>>, %arg6: memref<1x3x8x16xf32, #tpu.memory_space<vmem>>, %arg7: memref<1x4x8x16xf32, #tpu.memory_space<vmem>>) attributes {dimension_semantics = [#tpu.dimension_semantics<parallel>, #tpu.dimension_semantics<parallel>], iteration_bounds = array<i64: 2, 1>, scalar_prefetch = 0 : i64, scratch_operands = 0 : i64, tpu.core_type = #tpu.core_type<tc>, window_params = [{transform_indices = @transform_0, window_bounds = array<i64: 1, 3, 64>}, {transform_indices = @transform_1, window_bounds = array<i64: 1, 16, 3>}, {transform_indices = @transform_2, window_bounds = array<i64: 1, 3, 16>}, {transform_indices = @transform_3, window_bounds = array<i64: 1, 4, 64>}, {transform_indices = @transform_4, window_bounds = array<i64: 1, 3, 8, 16>}, {transform_indices = @transform_5, window_bounds = array<i64: 1, 4, 8, 16>}]} {
    %c0 = arith.constant 0 : index
    %c0_0 = arith.constant 0 : index
    %c0_1 = arith.constant 0 : index
    %0 = vector.load %arg2[%c0, %c0_0, %c0_1] : memref<1x3x64xf32, #tpu.memory_space<vmem>>, vector<1x3x64xf32>
    %1 = vector.shape_cast %0 : vector<1x3x64xf32> to vector<3x64xf32>
    %c0_2 = arith.constant 0 : index
    %c0_3 = arith.constant 0 : index
    %c0_4 = arith.constant 0 : index
    %2 = vector.load %arg3[%c0_2, %c0_3, %c0_4] : memref<1x16x3xf32, #tpu.memory_space<vmem>>, vector<1x16x3xf32>
    %3 = vector.shape_cast %2 : vector<1x16x3xf32> to vector<16x3xf32>
    %c0_5 = arith.constant 0 : index
    %c0_6 = arith.constant 0 : index
    %c0_7 = arith.constant 0 : index
    %4 = vector.load %arg4[%c0_5, %c0_6, %c0_7] : memref<1x3x16xf32, #tpu.memory_space<vmem>>, vector<1x3x16xf32>
    %5 = vector.shape_cast %4 : vector<1x3x16xf32> to vector<3x16xf32>
    %c0_8 = arith.constant 0 : index
    %c0_9 = arith.constant 0 : index
    %c0_10 = arith.constant 0 : index
    %6 = vector.load %arg5[%c0_8, %c0_9, %c0_10] : memref<1x4x64xf32, #tpu.memory_space<vmem>>, vector<1x4x64xf32>
    %7 = vector.shape_cast %6 : vector<1x4x64xf32> to vector<4x64xf32>
    %cst = arith.constant 0.000000e+00 : f32
    %8 = vector.broadcast %cst : f32 to vector<16x64xf32>
    %9 = vector.extract_strided_slice %3 {offsets = [0, 0], sizes = [16, 1], strides = [1, 1]} : vector<16x3xf32> to vector<16x1xf32>
    %10 = vector.extract_strided_slice %1 {offsets = [0, 0], sizes = [1, 64], strides = [1, 1]} : vector<3x64xf32> to vector<1x64xf32>
    %11 = vector.broadcast %9 : vector<16x1xf32> to vector<16x64xf32>
    %12 = vector.broadcast %10 : vector<1x64xf32> to vector<16x64xf32>
    %13 = arith.subf %11, %12 : vector<16x64xf32>
    %14 = arith.mulf %13, %13 : vector<16x64xf32>
    %15 = arith.addf %8, %14 : vector<16x64xf32>
    %16 = vector.extract_strided_slice %3 {offsets = [0, 1], sizes = [16, 1], strides = [1, 1]} : vector<16x3xf32> to vector<16x1xf32>
    %17 = vector.extract_strided_slice %1 {offsets = [1, 0], sizes = [1, 64], strides = [1, 1]} : vector<3x64xf32> to vector<1x64xf32>
    %18 = vector.broadcast %16 : vector<16x1xf32> to vector<16x64xf32>
    %19 = vector.broadcast %17 : vector<1x64xf32> to vector<16x64xf32>
    %20 = arith.subf %18, %19 : vector<16x64xf32>
    %21 = arith.mulf %20, %20 : vector<16x64xf32>
    %22 = arith.addf %15, %21 : vector<16x64xf32>
    %23 = vector.extract_strided_slice %3 {offsets = [0, 2], sizes = [16, 1], strides = [1, 1]} : vector<16x3xf32> to vector<16x1xf32>
    %24 = vector.extract_strided_slice %1 {offsets = [2, 0], sizes = [1, 64], strides = [1, 1]} : vector<3x64xf32> to vector<1x64xf32>
    %25 = vector.broadcast %23 : vector<16x1xf32> to vector<16x64xf32>
    %26 = vector.broadcast %24 : vector<1x64xf32> to vector<16x64xf32>
    %27 = arith.subf %25, %26 : vector<16x64xf32>
    %28 = arith.mulf %27, %27 : vector<16x64xf32>
    %29 = arith.addf %22, %28 : vector<16x64xf32>
    %cst_11 = arith.constant 1.225000e-01 : f32
    %30 = vector.broadcast %cst_11 : f32 to vector<16x64xf32>
    %31 = arith.cmpf olt, %29, %30 : vector<16x64xf32>
    %32 = tpu.iota {dimensions = array<i32: 0>} : vector<64x64xi32>
    %33 = tpu.iota {dimensions = array<i32: 1>} : vector<64x64xi32>
    %34 = arith.cmpi sle, %32, %33 : vector<64x64xi32>
    %35 = arith.extui %34 : vector<64x64xi1> to vector<64x64xi32>
    %36 = arith.sitofp %35 : vector<64x64xi32> to vector<64x64xf32>
    %37 = arith.truncf %36 : vector<64x64xf32> to vector<64x64xbf16>
    %38 = arith.extui %31 : vector<16x64xi1> to vector<16x64xi32>
    %39 = arith.sitofp %38 : vector<16x64xi32> to vector<16x64xf32>
    %40 = arith.truncf %39 : vector<16x64xf32> to vector<16x64xbf16>
    %cst_12 = arith.constant dense<0.000000e+00> : vector<16x64xf32>
    %41 = tpu.matmul %40, %37, %cst_12 {dimension_numbers = #tpu.dot_dimension_numbers<[1], [0], [0], [1], [0, 0, 1, 1], [], []>} : vector<16x64xbf16>, vector<64x64xbf16>, vector<16x64xf32> -> vector<16x64xf32>
    %42 = vector.extract_strided_slice %41 {offsets = [0, 63], sizes = [16, 1], strides = [1, 1]} : vector<16x64xf32> to vector<16x1xf32>
    %cst_13 = arith.constant 1.000000e+00 : f32
    %43 = vector.broadcast %cst_13 : f32 to vector<16x1xf32>
    %44 = arith.cmpf oge, %42, %43 : vector<16x1xf32>
    %45 = tpu.iota {dimensions = array<i32: 1>} : vector<1x64xi32>
    %c0_i32 = arith.constant 0 : i32
    %46 = vector.broadcast %c0_i32 : i32 to vector<1x64xi32>
    %47 = arith.cmpi eq, %45, %46 : vector<1x64xi32>
    %48 = arith.extui %47 : vector<1x64xi1> to vector<1x64xi32>
    %49 = arith.sitofp %48 : vector<1x64xi32> to vector<1x64xf32>
    %cst_14 = arith.constant 1.000000e+00 : f32
    %50 = vector.broadcast %cst_14 : f32 to vector<16x64xf32>
    %51 = arith.cmpf oeq, %41, %50 : vector<16x64xf32>
    %52 = arith.andi %31, %51 : vector<16x64xi1>
    %53 = arith.extui %52 : vector<16x64xi1> to vector<16x64xi32>
    %54 = arith.sitofp %53 : vector<16x64xi32> to vector<16x64xf32>
    %55 = vector.shape_cast %44 : vector<16x1xi1> to vector<16x1xi1>
    %56 = vector.broadcast %55 : vector<16x1xi1> to vector<16x64xi1>
    %57 = vector.shape_cast %49 : vector<1x64xf32> to vector<1x64xf32>
    %58 = vector.broadcast %57 : vector<1x64xf32> to vector<16x64xf32>
    %59 = arith.select %56, %54, %58 : vector<16x64xi1>, vector<16x64xf32>
    %cst_15 = arith.constant 2.000000e+00 : f32
    %60 = vector.broadcast %cst_15 : f32 to vector<16x64xf32>
    %61 = arith.cmpf oeq, %41, %60 : vector<16x64xf32>
    %62 = arith.andi %31, %61 : vector<16x64xi1>
    %63 = arith.extui %62 : vector<16x64xi1> to vector<16x64xi32>
    %64 = arith.sitofp %63 : vector<16x64xi32> to vector<16x64xf32>
    %cst_16 = arith.constant 2.000000e+00 : f32
    %65 = vector.broadcast %cst_16 : f32 to vector<16x1xf32>
    %66 = arith.cmpf oge, %42, %65 : vector<16x1xf32>
    %67 = vector.shape_cast %66 : vector<16x1xi1> to vector<16x1xi1>
    %68 = vector.broadcast %67 : vector<16x1xi1> to vector<16x64xi1>
    %69 = arith.select %68, %64, %59 : vector<16x64xi1>, vector<16x64xf32>
    %cst_17 = arith.constant dense<0.000000e+00> : vector<3x16xf32>
    %70 = tpu.matmul %1, %69, %cst_17 {dimension_numbers = #tpu.dot_dimension_numbers<[1], [1], [0], [0], [0, 0, 1, 0], [], []>} : vector<3x64xf32>, vector<16x64xf32>, vector<3x16xf32> -> vector<3x16xf32>
    %cst_18 = arith.constant dense<0.000000e+00> : vector<4x16xf32>
    %71 = tpu.matmul %7, %69, %cst_18 {dimension_numbers = #tpu.dot_dimension_numbers<[1], [1], [0], [0], [0, 0, 1, 0], [], []>} : vector<4x64xf32>, vector<16x64xf32>, vector<4x16xf32> -> vector<4x16xf32>
    %72 = arith.subf %70, %5 : vector<3x16xf32>
    %c0_19 = arith.constant 0 : index
    %c0_20 = arith.constant 0 : index
    %c0_21 = arith.constant 0 : index
    %c0_22 = arith.constant 0 : index
    %73 = vector.load %arg6[%c0_19, %c0_20, %c0_21, %c0_22] : memref<1x3x8x16xf32, #tpu.memory_space<vmem>>, vector<1x3x1x16xf32>
    %74 = vector.shape_cast %73 : vector<1x3x1x16xf32> to vector<3x16xf32>
    %75 = vector.shape_cast %72 : vector<3x16xf32> to vector<1x3x1x16xf32>
    tpu.vector_store %arg6[%c0_19, %c0_20, %c0_21, %c0_22], %75 {strides = array<i32>} : memref<1x3x8x16xf32, #tpu.memory_space<vmem>>, vector<1x3x1x16xf32>,
    %c0_23 = arith.constant 0 : index
    %c0_24 = arith.constant 0 : index
    %c0_25 = arith.constant 0 : index
    %c0_26 = arith.constant 0 : index
    %76 = vector.load %arg7[%c0_23, %c0_24, %c0_25, %c0_26] : memref<1x4x8x16xf32, #tpu.memory_space<vmem>>, vector<1x4x1x16xf32>
    %77 = vector.shape_cast %76 : vector<1x4x1x16xf32> to vector<4x16xf32>
    %78 = vector.shape_cast %71 : vector<4x16xf32> to vector<1x4x1x16xf32>
    tpu.vector_store %arg7[%c0_23, %c0_24, %c0_25, %c0_26], %78 {strides = array<i32>} : memref<1x4x8x16xf32, #tpu.memory_space<vmem>>, vector<1x4x1x16xf32>,
    %cst_27 = arith.constant 3.000000e+00 : f32
    %79 = vector.broadcast %cst_27 : f32 to vector<16x64xf32>
    %80 = arith.cmpf oeq, %41, %79 : vector<16x64xf32>
    %81 = arith.andi %31, %80 : vector<16x64xi1>
    %82 = arith.extui %81 : vector<16x64xi1> to vector<16x64xi32>
    %83 = arith.sitofp %82 : vector<16x64xi32> to vector<16x64xf32>
    %cst_28 = arith.constant 3.000000e+00 : f32
    %84 = vector.broadcast %cst_28 : f32 to vector<16x1xf32>
    %85 = arith.cmpf oge, %42, %84 : vector<16x1xf32>
    %86 = vector.shape_cast %85 : vector<16x1xi1> to vector<16x1xi1>
    %87 = vector.broadcast %86 : vector<16x1xi1> to vector<16x64xi1>
    %88 = arith.select %87, %83, %59 : vector<16x64xi1>, vector<16x64xf32>
    %cst_29 = arith.constant dense<0.000000e+00> : vector<3x16xf32>
    %89 = tpu.matmul %1, %88, %cst_29 {dimension_numbers = #tpu.dot_dimension_numbers<[1], [1], [0], [0], [0, 0, 1, 0], [], []>} : vector<3x64xf32>, vector<16x64xf32>, vector<3x16xf32> -> vector<3x16xf32>
    %cst_30 = arith.constant dense<0.000000e+00> : vector<4x16xf32>
    %90 = tpu.matmul %7, %88, %cst_30 {dimension_numbers = #tpu.dot_dimension_numbers<[1], [1], [0], [0], [0, 0, 1, 0], [], []>} : vector<4x64xf32>, vector<16x64xf32>, vector<4x16xf32> -> vector<4x16xf32>
    %91 = arith.subf %89, %5 : vector<3x16xf32>
    %c0_31 = arith.constant 0 : index
    %c0_32 = arith.constant 0 : index
    %c1 = arith.constant 1 : index
    %c0_33 = arith.constant 0 : index
    %92 = vector.load %arg6[%c0_31, %c0_32, %c1, %c0_33] : memref<1x3x8x16xf32, #tpu.memory_space<vmem>>, vector<1x3x1x16xf32>
    %93 = vector.shape_cast %92 : vector<1x3x1x16xf32> to vector<3x16xf32>
    %94 = vector.shape_cast %91 : vector<3x16xf32> to vector<1x3x1x16xf32>
    tpu.vector_store %arg6[%c0_31, %c0_32, %c1, %c0_33], %94 {strides = array<i32>} : memref<1x3x8x16xf32, #tpu.memory_space<vmem>>, vector<1x3x1x16xf32>,
    %c0_34 = arith.constant 0 : index
    %c0_35 = arith.constant 0 : index
    %c1_36 = arith.constant 1 : index
    %c0_37 = arith.constant 0 : index
    %95 = vector.load %arg7[%c0_34, %c0_35, %c1_36, %c0_37] : memref<1x4x8x16xf32, #tpu.memory_space<vmem>>, vector<1x4x1x16xf32>
    %96 = vector.shape_cast %95 : vector<1x4x1x16xf32> to vector<4x16xf32>
    %97 = vector.shape_cast %90 : vector<4x16xf32> to vector<1x4x1x16xf32>
    tpu.vector_store %arg7[%c0_34, %c0_35, %c1_36, %c0_37], %97 {strides = array<i32>} : memref<1x4x8x16xf32, #tpu.memory_space<vmem>>, vector<1x4x1x16xf32>,
    %cst_38 = arith.constant 4.000000e+00 : f32
    %98 = vector.broadcast %cst_38 : f32 to vector<16x64xf32>
    %99 = arith.cmpf oeq, %41, %98 : vector<16x64xf32>
    %100 = arith.andi %31, %99 : vector<16x64xi1>
    %101 = arith.extui %100 : vector<16x64xi1> to vector<16x64xi32>
    %102 = arith.sitofp %101 : vector<16x64xi32> to vector<16x64xf32>
    %cst_39 = arith.constant 4.000000e+00 : f32
    %103 = vector.broadcast %cst_39 : f32 to vector<16x1xf32>
    %104 = arith.cmpf oge, %42, %103 : vector<16x1xf32>
    %105 = vector.shape_cast %104 : vector<16x1xi1> to vector<16x1xi1>
    %106 = vector.broadcast %105 : vector<16x1xi1> to vector<16x64xi1>
    %107 = arith.select %106, %102, %59 : vector<16x64xi1>, vector<16x64xf32>
    %cst_40 = arith.constant dense<0.000000e+00> : vector<3x16xf32>
    %108 = tpu.matmul %1, %107, %cst_40 {dimension_numbers = #tpu.dot_dimension_numbers<[1], [1], [0], [0], [0, 0, 1, 0], [], []>} : vector<3x64xf32>, vector<16x64xf32>, vector<3x16xf32> -> vector<3x16xf32>
    %cst_41 = arith.constant dense<0.000000e+00> : vector<4x16xf32>
    %109 = tpu.matmul %7, %107, %cst_41 {dimension_numbers = #tpu.dot_dimension_numbers<[1], [1], [0], [0], [0, 0, 1, 0], [], []>} : vector<4x64xf32>, vector<16x64xf32>, vector<4x16xf32> -> vector<4x16xf32>
    %110 = arith.subf %108, %5 : vector<3x16xf32>
    %c0_42 = arith.constant 0 : index
    %c0_43 = arith.constant 0 : index
    %c2 = arith.constant 2 : index
    %c0_44 = arith.constant 0 : index
    %111 = vector.load %arg6[%c0_42, %c0_43, %c2, %c0_44] : memref<1x3x8x16xf32, #tpu.memory_space<vmem>>, vector<1x3x1x16xf32>
    %112 = vector.shape_cast %111 : vector<1x3x1x16xf32> to vector<3x16xf32>
    %113 = vector.shape_cast %110 : vector<3x16xf32> to vector<1x3x1x16xf32>
    tpu.vector_store %arg6[%c0_42, %c0_43, %c2, %c0_44], %113 {strides = array<i32>} : memref<1x3x8x16xf32, #tpu.memory_space<vmem>>, vector<1x3x1x16xf32>,
    %c0_45 = arith.constant 0 : index
    %c0_46 = arith.constant 0 : index
    %c2_47 = arith.constant 2 : index
    %c0_48 = arith.constant 0 : index
    %114 = vector.load %arg7[%c0_45, %c0_46, %c2_47, %c0_48] : memref<1x4x8x16xf32, #tpu.memory_space<vmem>>, vector<1x4x1x16xf32>
    %115 = vector.shape_cast %114 : vector<1x4x1x16xf32> to vector<4x16xf32>
    %116 = vector.shape_cast %109 : vector<4x16xf32> to vector<1x4x1x16xf32>
    tpu.vector_store %arg7[%c0_45, %c0_46, %c2_47, %c0_48], %116 {strides = array<i32>} : memref<1x4x8x16xf32, #tpu.memory_space<vmem>>, vector<1x4x1x16xf32>,
    %cst_49 = arith.constant 5.000000e+00 : f32
    %117 = vector.broadcast %cst_49 : f32 to vector<16x64xf32>
    %118 = arith.cmpf oeq, %41, %117 : vector<16x64xf32>
    %119 = arith.andi %31, %118 : vector<16x64xi1>
    %120 = arith.extui %119 : vector<16x64xi1> to vector<16x64xi32>
    %121 = arith.sitofp %120 : vector<16x64xi32> to vector<16x64xf32>
    %cst_50 = arith.constant 5.000000e+00 : f32
    %122 = vector.broadcast %cst_50 : f32 to vector<16x1xf32>
    %123 = arith.cmpf oge, %42, %122 : vector<16x1xf32>
    %124 = vector.shape_cast %123 : vector<16x1xi1> to vector<16x1xi1>
    %125 = vector.broadcast %124 : vector<16x1xi1> to vector<16x64xi1>
    %126 = arith.select %125, %121, %59 : vector<16x64xi1>, vector<16x64xf32>
    %cst_51 = arith.constant dense<0.000000e+00> : vector<3x16xf32>
    %127 = tpu.matmul %1, %126, %cst_51 {dimension_numbers = #tpu.dot_dimension_numbers<[1], [1], [0], [0], [0, 0, 1, 0], [], []>} : vector<3x64xf32>, vector<16x64xf32>, vector<3x16xf32> -> vector<3x16xf32>
    %cst_52 = arith.constant dense<0.000000e+00> : vector<4x16xf32>
    %128 = tpu.matmul %7, %126, %cst_52 {dimension_numbers = #tpu.dot_dimension_numbers<[1], [1], [0], [0], [0, 0, 1, 0], [], []>} : vector<4x64xf32>, vector<16x64xf32>, vector<4x16xf32> -> vector<4x16xf32>
    %129 = arith.subf %127, %5 : vector<3x16xf32>
    %c0_53 = arith.constant 0 : index
    %c0_54 = arith.constant 0 : index
    %c3 = arith.constant 3 : index
    %c0_55 = arith.constant 0 : index
    %130 = vector.load %arg6[%c0_53, %c0_54, %c3, %c0_55] : memref<1x3x8x16xf32, #tpu.memory_space<vmem>>, vector<1x3x1x16xf32>
    %131 = vector.shape_cast %130 : vector<1x3x1x16xf32> to vector<3x16xf32>
    %132 = vector.shape_cast %129 : vector<3x16xf32> to vector<1x3x1x16xf32>
    tpu.vector_store %arg6[%c0_53, %c0_54, %c3, %c0_55], %132 {strides = array<i32>} : memref<1x3x8x16xf32, #tpu.memory_space<vmem>>, vector<1x3x1x16xf32>,
    %c0_56 = arith.constant 0 : index
    %c0_57 = arith.constant 0 : index
    %c3_58 = arith.constant 3 : index
    %c0_59 = arith.constant 0 : index
    %133 = vector.load %arg7[%c0_56, %c0_57, %c3_58, %c0_59] : memref<1x4x8x16xf32, #tpu.memory_space<vmem>>, vector<1x4x1x16xf32>
    %134 = vector.shape_cast %133 : vector<1x4x1x16xf32> to vector<4x16xf32>
    %135 = vector.shape_cast %128 : vector<4x16xf32> to vector<1x4x1x16xf32>
    tpu.vector_store %arg7[%c0_56, %c0_57, %c3_58, %c0_59], %135 {strides = array<i32>} : memref<1x4x8x16xf32, #tpu.memory_space<vmem>>, vector<1x4x1x16xf32>,
    %cst_60 = arith.constant 6.000000e+00 : f32
    %136 = vector.broadcast %cst_60 : f32 to vector<16x64xf32>
    %137 = arith.cmpf oeq, %41, %136 : vector<16x64xf32>
    %138 = arith.andi %31, %137 : vector<16x64xi1>
    %139 = arith.extui %138 : vector<16x64xi1> to vector<16x64xi32>
    %140 = arith.sitofp %139 : vector<16x64xi32> to vector<16x64xf32>
    %cst_61 = arith.constant 6.000000e+00 : f32
    %141 = vector.broadcast %cst_61 : f32 to vector<16x1xf32>
    %142 = arith.cmpf oge, %42, %141 : vector<16x1xf32>
    %143 = vector.shape_cast %142 : vector<16x1xi1> to vector<16x1xi1>
    %144 = vector.broadcast %143 : vector<16x1xi1> to vector<16x64xi1>
    %145 = arith.select %144, %140, %59 : vector<16x64xi1>, vector<16x64xf32>
    %cst_62 = arith.constant dense<0.000000e+00> : vector<3x16xf32>
    %146 = tpu.matmul %1, %145, %cst_62 {dimension_numbers = #tpu.dot_dimension_numbers<[1], [1], [0], [0], [0, 0, 1, 0], [], []>} : vector<3x64xf32>, vector<16x64xf32>, vector<3x16xf32> -> vector<3x16xf32>
    %cst_63 = arith.constant dense<0.000000e+00> : vector<4x16xf32>
    %147 = tpu.matmul %7, %145, %cst_63 {dimension_numbers = #tpu.dot_dimension_numbers<[1], [1], [0], [0], [0, 0, 1, 0], [], []>} : vector<4x64xf32>, vector<16x64xf32>, vector<4x16xf32> -> vector<4x16xf32>
    %148 = arith.subf %146, %5 : vector<3x16xf32>
    %c0_64 = arith.constant 0 : index
    %c0_65 = arith.constant 0 : index
    %c4 = arith.constant 4 : index
    %c0_66 = arith.constant 0 : index
    %149 = vector.load %arg6[%c0_64, %c0_65, %c4, %c0_66] : memref<1x3x8x16xf32, #tpu.memory_space<vmem>>, vector<1x3x1x16xf32>
    %150 = vector.shape_cast %149 : vector<1x3x1x16xf32> to vector<3x16xf32>
    %151 = vector.shape_cast %148 : vector<3x16xf32> to vector<1x3x1x16xf32>
    tpu.vector_store %arg6[%c0_64, %c0_65, %c4, %c0_66], %151 {strides = array<i32>} : memref<1x3x8x16xf32, #tpu.memory_space<vmem>>, vector<1x3x1x16xf32>,
    %c0_67 = arith.constant 0 : index
    %c0_68 = arith.constant 0 : index
    %c4_69 = arith.constant 4 : index
    %c0_70 = arith.constant 0 : index
    %152 = vector.load %arg7[%c0_67, %c0_68, %c4_69, %c0_70] : memref<1x4x8x16xf32, #tpu.memory_space<vmem>>, vector<1x4x1x16xf32>
    %153 = vector.shape_cast %152 : vector<1x4x1x16xf32> to vector<4x16xf32>
    %154 = vector.shape_cast %147 : vector<4x16xf32> to vector<1x4x1x16xf32>
    tpu.vector_store %arg7[%c0_67, %c0_68, %c4_69, %c0_70], %154 {strides = array<i32>} : memref<1x4x8x16xf32, #tpu.memory_space<vmem>>, vector<1x4x1x16xf32>,
    %cst_71 = arith.constant 7.000000e+00 : f32
    %155 = vector.broadcast %cst_71 : f32 to vector<16x64xf32>
    %156 = arith.cmpf oeq, %41, %155 : vector<16x64xf32>
    %157 = arith.andi %31, %156 : vector<16x64xi1>
    %158 = arith.extui %157 : vector<16x64xi1> to vector<16x64xi32>
    %159 = arith.sitofp %158 : vector<16x64xi32> to vector<16x64xf32>
    %cst_72 = arith.constant 7.000000e+00 : f32
    %160 = vector.broadcast %cst_72 : f32 to vector<16x1xf32>
    %161 = arith.cmpf oge, %42, %160 : vector<16x1xf32>
    %162 = vector.shape_cast %161 : vector<16x1xi1> to vector<16x1xi1>
    %163 = vector.broadcast %162 : vector<16x1xi1> to vector<16x64xi1>
    %164 = arith.select %163, %159, %59 : vector<16x64xi1>, vector<16x64xf32>
    %cst_73 = arith.constant dense<0.000000e+00> : vector<3x16xf32>
    %165 = tpu.matmul %1, %164, %cst_73 {dimension_numbers = #tpu.dot_dimension_numbers<[1], [1], [0], [0], [0, 0, 1, 0], [], []>} : vector<3x64xf32>, vector<16x64xf32>, vector<3x16xf32> -> vector<3x16xf32>
    %cst_74 = arith.constant dense<0.000000e+00> : vector<4x16xf32>
    %166 = tpu.matmul %7, %164, %cst_74 {dimension_numbers = #tpu.dot_dimension_numbers<[1], [1], [0], [0], [0, 0, 1, 0], [], []>} : vector<4x64xf32>, vector<16x64xf32>, vector<4x16xf32> -> vector<4x16xf32>
    %167 = arith.subf %165, %5 : vector<3x16xf32>
    %c0_75 = arith.constant 0 : index
    %c0_76 = arith.constant 0 : index
    %c5 = arith.constant 5 : index
    %c0_77 = arith.constant 0 : index
    %168 = vector.load %arg6[%c0_75, %c0_76, %c5, %c0_77] : memref<1x3x8x16xf32, #tpu.memory_space<vmem>>, vector<1x3x1x16xf32>
    %169 = vector.shape_cast %168 : vector<1x3x1x16xf32> to vector<3x16xf32>
    %170 = vector.shape_cast %167 : vector<3x16xf32> to vector<1x3x1x16xf32>
    tpu.vector_store %arg6[%c0_75, %c0_76, %c5, %c0_77], %170 {strides = array<i32>} : memref<1x3x8x16xf32, #tpu.memory_space<vmem>>, vector<1x3x1x16xf32>,
    %c0_78 = arith.constant 0 : index
    %c0_79 = arith.constant 0 : index
    %c5_80 = arith.constant 5 : index
    %c0_81 = arith.constant 0 : index
    %171 = vector.load %arg7[%c0_78, %c0_79, %c5_80, %c0_81] : memref<1x4x8x16xf32, #tpu.memory_space<vmem>>, vector<1x4x1x16xf32>
    %172 = vector.shape_cast %171 : vector<1x4x1x16xf32> to vector<4x16xf32>
    %173 = vector.shape_cast %166 : vector<4x16xf32> to vector<1x4x1x16xf32>
    tpu.vector_store %arg7[%c0_78, %c0_79, %c5_80, %c0_81], %173 {strides = array<i32>} : memref<1x4x8x16xf32, #tpu.memory_space<vmem>>, vector<1x4x1x16xf32>,
    %cst_82 = arith.constant 8.000000e+00 : f32
    %174 = vector.broadcast %cst_82 : f32 to vector<16x64xf32>
    %175 = arith.cmpf oeq, %41, %174 : vector<16x64xf32>
    %176 = arith.andi %31, %175 : vector<16x64xi1>
    %177 = arith.extui %176 : vector<16x64xi1> to vector<16x64xi32>
    %178 = arith.sitofp %177 : vector<16x64xi32> to vector<16x64xf32>
    %cst_83 = arith.constant 8.000000e+00 : f32
    %179 = vector.broadcast %cst_83 : f32 to vector<16x1xf32>
    %180 = arith.cmpf oge, %42, %179 : vector<16x1xf32>
    %181 = vector.shape_cast %180 : vector<16x1xi1> to vector<16x1xi1>
    %182 = vector.broadcast %181 : vector<16x1xi1> to vector<16x64xi1>
    %183 = arith.select %182, %178, %59 : vector<16x64xi1>, vector<16x64xf32>
    %cst_84 = arith.constant dense<0.000000e+00> : vector<3x16xf32>
    %184 = tpu.matmul %1, %183, %cst_84 {dimension_numbers = #tpu.dot_dimension_numbers<[1], [1], [0], [0], [0, 0, 1, 0], [], []>} : vector<3x64xf32>, vector<16x64xf32>, vector<3x16xf32> -> vector<3x16xf32>
    %cst_85 = arith.constant dense<0.000000e+00> : vector<4x16xf32>
    %185 = tpu.matmul %7, %183, %cst_85 {dimension_numbers = #tpu.dot_dimension_numbers<[1], [1], [0], [0], [0, 0, 1, 0], [], []>} : vector<4x64xf32>, vector<16x64xf32>, vector<4x16xf32> -> vector<4x16xf32>
    %186 = arith.subf %184, %5 : vector<3x16xf32>
    %c0_86 = arith.constant 0 : index
    %c0_87 = arith.constant 0 : index
    %c6 = arith.constant 6 : index
    %c0_88 = arith.constant 0 : index
    %187 = vector.load %arg6[%c0_86, %c0_87, %c6, %c0_88] : memref<1x3x8x16xf32, #tpu.memory_space<vmem>>, vector<1x3x1x16xf32>
    %188 = vector.shape_cast %187 : vector<1x3x1x16xf32> to vector<3x16xf32>
    %189 = vector.shape_cast %186 : vector<3x16xf32> to vector<1x3x1x16xf32>
    tpu.vector_store %arg6[%c0_86, %c0_87, %c6, %c0_88], %189 {strides = array<i32>} : memref<1x3x8x16xf32, #tpu.memory_space<vmem>>, vector<1x3x1x16xf32>,
    %c0_89 = arith.constant 0 : index
    %c0_90 = arith.constant 0 : index
    %c6_91 = arith.constant 6 : index
    %c0_92 = arith.constant 0 : index
    %190 = vector.load %arg7[%c0_89, %c0_90, %c6_91, %c0_92] : memref<1x4x8x16xf32, #tpu.memory_space<vmem>>, vector<1x4x1x16xf32>
    %191 = vector.shape_cast %190 : vector<1x4x1x16xf32> to vector<4x16xf32>
    %192 = vector.shape_cast %185 : vector<4x16xf32> to vector<1x4x1x16xf32>
    tpu.vector_store %arg7[%c0_89, %c0_90, %c6_91, %c0_92], %192 {strides = array<i32>} : memref<1x4x8x16xf32, #tpu.memory_space<vmem>>, vector<1x4x1x16xf32>,
    %cst_93 = arith.constant 9.000000e+00 : f32
    %193 = vector.broadcast %cst_93 : f32 to vector<16x64xf32>
    %194 = arith.cmpf oeq, %41, %193 : vector<16x64xf32>
    %195 = arith.andi %31, %194 : vector<16x64xi1>
    %196 = arith.extui %195 : vector<16x64xi1> to vector<16x64xi32>
    %197 = arith.sitofp %196 : vector<16x64xi32> to vector<16x64xf32>
    %cst_94 = arith.constant 9.000000e+00 : f32
    %198 = vector.broadcast %cst_94 : f32 to vector<16x1xf32>
    %199 = arith.cmpf oge, %42, %198 : vector<16x1xf32>
    %200 = vector.shape_cast %199 : vector<16x1xi1> to vector<16x1xi1>
    %201 = vector.broadcast %200 : vector<16x1xi1> to vector<16x64xi1>
    %202 = arith.select %201, %197, %59 : vector<16x64xi1>, vector<16x64xf32>
    %cst_95 = arith.constant dense<0.000000e+00> : vector<3x16xf32>
    %203 = tpu.matmul %1, %202, %cst_95 {dimension_numbers = #tpu.dot_dimension_numbers<[1], [1], [0], [0], [0, 0, 1, 0], [], []>} : vector<3x64xf32>, vector<16x64xf32>, vector<3x16xf32> -> vector<3x16xf32>
    %cst_96 = arith.constant dense<0.000000e+00> : vector<4x16xf32>
    %204 = tpu.matmul %7, %202, %cst_96 {dimension_numbers = #tpu.dot_dimension_numbers<[1], [1], [0], [0], [0, 0, 1, 0], [], []>} : vector<4x64xf32>, vector<16x64xf32>, vector<4x16xf32> -> vector<4x16xf32>
    %205 = arith.subf %203, %5 : vector<3x16xf32>
    %c0_97 = arith.constant 0 : index
    %c0_98 = arith.constant 0 : index
    %c7 = arith.constant 7 : index
    %c0_99 = arith.constant 0 : index
    %206 = vector.load %arg6[%c0_97, %c0_98, %c7, %c0_99] : memref<1x3x8x16xf32, #tpu.memory_space<vmem>>, vector<1x3x1x16xf32>
    %207 = vector.shape_cast %206 : vector<1x3x1x16xf32> to vector<3x16xf32>
    %208 = vector.shape_cast %205 : vector<3x16xf32> to vector<1x3x1x16xf32>
    tpu.vector_store %arg6[%c0_97, %c0_98, %c7, %c0_99], %208 {strides = array<i32>} : memref<1x3x8x16xf32, #tpu.memory_space<vmem>>, vector<1x3x1x16xf32>,
    %c0_100 = arith.constant 0 : index
    %c0_101 = arith.constant 0 : index
    %c7_102 = arith.constant 7 : index
    %c0_103 = arith.constant 0 : index
    %209 = vector.load %arg7[%c0_100, %c0_101, %c7_102, %c0_103] : memref<1x4x8x16xf32, #tpu.memory_space<vmem>>, vector<1x4x1x16xf32>
    %210 = vector.shape_cast %209 : vector<1x4x1x16xf32> to vector<4x16xf32>
    %211 = vector.shape_cast %204 : vector<4x16xf32> to vector<1x4x1x16xf32>
    tpu.vector_store %arg7[%c0_100, %c0_101, %c7_102, %c0_103], %211 {strides = array<i32>} : memref<1x4x8x16xf32, #tpu.memory_space<vmem>>, vector<1x4x1x16xf32>,
    return
  }
  func.func @transform_0(%arg0: i32, %arg1: i32) -> (i32, i32, i32) {
    %c0_i32 = arith.constant 0 : i32
    %c0_i32_0 = arith.constant 0 : i32
    %c0_i32_1 = arith.constant 0 : i32
    return %arg0, %c0_i32, %c0_i32_0 : i32, i32, i32
  }
  func.func @transform_1(%arg0: i32, %arg1: i32) -> (i32, i32, i32) {
    %c0_i32 = arith.constant 0 : i32
    %c0_i32_0 = arith.constant 0 : i32
    return %arg0, %arg1, %c0_i32 : i32, i32, i32
  }
  func.func @transform_2(%arg0: i32, %arg1: i32) -> (i32, i32, i32) {
    %c0_i32 = arith.constant 0 : i32
    %c0_i32_0 = arith.constant 0 : i32
    return %arg0, %c0_i32, %arg1 : i32, i32, i32
  }
  func.func @transform_3(%arg0: i32, %arg1: i32) -> (i32, i32, i32) {
    %c0_i32 = arith.constant 0 : i32
    %c0_i32_0 = arith.constant 0 : i32
    %c0_i32_1 = arith.constant 0 : i32
    return %arg0, %c0_i32, %c0_i32_0 : i32, i32, i32
  }
  func.func @transform_4(%arg0: i32, %arg1: i32) -> (i32, i32, i32, i32) {
    %c0_i32 = arith.constant 0 : i32
    %c0_i32_0 = arith.constant 0 : i32
    %c0_i32_1 = arith.constant 0 : i32
    return %arg0, %c0_i32, %c0_i32_0, %arg1 : i32, i32, i32, i32
  }
  func.func @transform_5(%arg0: i32, %arg1: i32) -> (i32, i32, i32, i32) {
    %c0_i32 = arith.constant 0 : i32
    %c0_i32_0 = arith.constant 0 : i32
    %c0_i32_1 = arith.constant 0 : i32
    return %arg0, %c0_i32, %c0_i32_0, %arg1 : i32, i32, i32, i32
  }
}

</mosaic_0001>

<bundles_post_ra>
// kernel: tpu_custom_call.1
= control target key start
LH: loop header
LB: loop body
LE: loop exit
PB: predicated region body
PF: predicated region fallthrough
CT: control target
= control target key end

     0   :  { %11 = vsyncpa [#allocation3], 0  ;;  %s3729_s0 = inlined_call_operand.vmem [shape: f32[2,3,64], index: 0, kind: input, shape index: {}]   ;;  %s3730_s1 = inlined_call_operand.vmem [shape: f32[2,16,3], index: 1, kind: input, shape index: {}]   ;;  %s3731_s2 = inlined_call_operand.vmem [shape: f32[2,3,16], index: 2, kind: input, shape index: {}]   ;;  %s3732_s3 = inlined_call_operand.vmem [shape: f32[2,4,64], index: 3, kind: input, shape index: {}]   ;;  %s3733_s4 = inlined_call_operand.hbm [shape: f32[2,3,8,16], index: 4, kind: output, shape index: {0}]   ;;  %s3734_s5 = inlined_call_operand.hbm [shape: f32[2,4,8,16], index: 5, kind: output, shape index: {1}]  }
   0x1   :  { %13 = vsyncpa [#allocation3 + $0x1], 0 }
   0x2   :  { %14 = vsyncpa [#allocation5], 0 }
   0x3   :  { %16 = vsyncpa [#allocation5 + $0x1], 0  ;;  %s3067_s18 = smov 0   ;;  %s3069_s19 = smov 0  }
   0x4   :  { %s3071_s20 = smov 0   ;;  %s3073_s21 = smov 0  }
   0x5   :  { %s3075_s22 = smov 0   ;;  %s3077_s23 = smov 0  }
   0x6 LB: > { %s2557_s24 = sadd.s32 4294967295, %s3023_s23   ;;  %s2558_s25 = sadd.s32 4294967294, %s3023_s23   ;;  %s3023_s23 = sphi %s3077_s23, %s22_s23   ;;  %s3019_s22 = sphi %s3075_s22, %s3741_s22   ;;  %s3015_s21 = sphi %s3073_s21, %s3740_s21   ;;  %s3011_s20 = sphi %s3071_s20, %s3739_s20   ;;  %s3007_s19 = sphi %s3069_s19, %s3738_s19   ;;  %s3003_s18 = sphi %s3067_s18, %s3737_s18  }
   0x7   : > { %s34_s26 = sadd.s32 1, %s3019_s22  ;;  %s151_s27 = sadd.s32 1, %s3011_s20 }
   0x8   : > { %p36_p0 = scmp.ge.s32.totalorder %s34_s26, 2  ;;  %p161_p1 = scmp.ne.s32.totalorder %s3011_s20, %s3007_s19 }
   0x9   : > { %p162_p2 = scmp.eq.s32.totalorder %s2557_s24, 1  ;;  %p167_p3 = scmp.ne.s32.totalorder %s3007_s19, %s3003_s18 }
   0xa   : > { %s3743_s26 = smov (%p36_p0, %s34_s26), 0  ;;  %p168_p5 = scmp.eq.s32.totalorder %s2558_s25, 1 }
   0xb   : > { %p3107_p4 = por %p162_p2, %p161_p1  ;;  %s146_s29 = ssub.s32 %s3019_s22, %s3743_s26 }
   0xc   : > { %p2561_p6 = scmp.ge.s32.totalorder %s3023_s23, 1  ;;  %p149_p7 = scmp.eq.s32.totalorder %s146_s29, 0 }
   0xd   : > { %p3114_p8 = por %p168_p5, %p167_p3  ;;  %p251_p9 = scmp.lt.s32.totalorder %s3023_s23, 3 }
   0xe   : > { %s3120_s6 = scalar_select %p149_p7, %s3011_s20, %s151_s27  }
   0xf   : > { %p252_p10 = pnand %p2561_p6, %p251_p9 }
  0x10   : > { %p303_p11 = scmp.lt.s32.totalorder (!%p252_p10), %s3015_s21, 1  ;;  %s3033_s25 = smov (!%p252_p10), [#allocation2]  }
  0x11   : > { %255 = sbr.rel (%p252_p10) target bundleno = 798 (0x31e), region = 36  ;;  %s2921_s27 = sshll.u32 (!%p252_p10), %s3033_s25, 4  ;;  %s2922_s27 = int_to_ptr.vmem [resolvable:$false] %s2921_s27 }
  0x16   : > { %v344_v0 = vlaneseq  ;;  %v3025_v1 = vmov 1   ;;  %v3026_v2 = vmov 0   ;;  %s3125_s7 = scalar_select %p303_p11, %s3015_s21, 1  ;;  %v3027_v8 = vmov 0.0  }
  0x17   : > { %2912 = vset.pattern.permute.xlu1 %v3025_v1  ;;  %2911 = vset.pattern.permute.xlu0 %v3026_v2  ;;  %v3028_v12 = vmov 1.0|1.0   ;;  %v3029_v15 = vmov 2   ;;  %vm3030_vm12 = vmmov 0   ;;  %vm436_vm15 = vcmask 523264  }
  0x18   : > { %v3127_v3 = vshrl.u32 %v344_v0, 7  ;;  %v3129_v4 = vand.u32 127, %v344_v0  ;;  %s2660_s8 = sshll.u32 %s3125_s7, 4  ;;  %2715 = vmatprep.subr.bf16.mxu0 %v3027_v8  ;;  %2727 = vmatprep.subr.mxu1 %v3027_v8  ;;  %s3162_s12 = sshll.u32 %s3125_s7, 2  ;;  %v3031_v49 = vmov 63  }
  0x19   : > { %s315_s11 = scalar_lea.vmem %s3730_s1, %s2660_s8  ;;  %2723 = vmatprep.mubr.msk.bf16.mxu0 %vm3030_vm12, %v3027_v8  ;;  %2731 = vmatprep.mubr.msk.f32.mxu1 %vm3030_vm12, %v3027_v8  ;;  %s306_s15 = scalar_lea.vmem %s3729_s0, %s3162_s12 }
  0x1a   : > { %v399_v5 = vadd.s32 48, %v3127_v3  ;;  %v400_v6 = vadd.s32 56, %v3127_v3  ;;  %v330_v7 = vld [vmem:[%s315_s11] sm:$0xff]  ;;  %v397_v9 = vadd.s32 32, %v3127_v3  ;;  %v331_v10 = vld [vmem:[%s315_s11 + $0x8] sm:$0xff]  ;;  %v398_v11 = vadd.s32 40, %v3127_v3  ;;  %s327_s24 = scalar_lea.vmem %s3732_s3, %s3162_s12  ;;  %s323_s29 = scalar_lea.vmem %s3731_s2, %s3162_s12 }
  0x1b   : > { %355 = vperm.xlu1 %2912, %v330_v7   ;;  %336 = vperm.xlu0 %2911, %v330_v7   ;;  %v395_v13 = vadd.s32 16, %v3127_v3  ;;  %v396_v14 = vadd.s32 24, %v3127_v3  ;;  %v394_v16 = vadd.s32 8, %v3127_v3  ;;  %vm403_vm9 = vcmp.le.s32.totalorder %v3127_v3, %v3129_v4  ;;  %v3170_v19 = vld [vmem:[%s306_s15] sm:$0x7]  ;;  %s3458_s7 = sand.u32 1, %s3007_s19  }
  0x1c   : > { %vm409_vm0 = vcmp.le.s32.totalorder %v399_v5, %v3129_v4  ;;  %vm410_vm1 = vcmp.le.s32.totalorder %v400_v6, %v3129_v4  ;;  %vm407_vm3 = vcmp.le.s32.totalorder %v397_v9, %v3129_v4  ;;  %vm408_vm4 = vcmp.le.s32.totalorder %v398_v11, %v3129_v4  ;;  %s2839_s8 = smul.u32 24, %s3458_s7  ;;  %s2562_s10 = sshll.u32 %s3458_s7, 5 }
  0x1d   : > { %vm2578_vm2 = vmpackc.low %vm410_vm1, %vm409_vm0  ;;  %vm405_vm6 = vcmp.le.s32.totalorder %v395_v13, %v3129_v4  ;;  %vm406_vm7 = vcmp.le.s32.totalorder %v396_v14, %v3129_v4  ;;  %vm404_vm10 = vcmp.le.s32.totalorder %v394_v16, %v3129_v4  ;;  %v364_v17 = vsub.s32 1, %v3127_v3  ;;  %s3488_s11 = scalar_lea.vmem [#allocation4], %s2562_s10  ;;  %s2840_s12 = smul.u32 384, %s3015_s21 }
  0x1e   : > { %2716 = vmatpush3.bf16.msk.msra.mxu0 %vm2578_vm2, %v3028_v12  ;;  %vm2580_vm5 = vmpackc.low %vm408_vm4, %vm407_vm3  ;;  %v346_v18 = vsub.s32 0, %v3127_v3  ;;  %v382_v24 = vsub.s32 2, %v3127_v3  ;;  %s3471_s9 = scalar_lea.vmem [#allocation2], %s2839_s8  ;;  %s2370_s17 = scalar_lea.sflag [#allocation3], %s3458_s7 }
  0x1f   : > { %2717 = vmatprep.subr.bf16.mxu0 %v3027_v8  ;;  %359 = vperm.xlu1 %2912, %v331_v10   ;;  %vm2582_vm8 = vmpackc.low %vm406_vm7, %vm405_vm6  ;;  %v365_v21 = vrot.slane %v3170_v19, %v364_v17  ;;  %s2389_s13 = sshll.u32 %s3471_s9, 4  ;;  %s3622_s16 = scalar_lea.hbm %s3733_s4, %s2840_s12  ;;  %s3613_s13 = int_to_ptr.vmem [resolvable:$true] %s2389_s13 }
  0x20   : > { %341 = vperm.xlu0 %2911, %v331_v10   ;;  %vm2584_vm11 = vmpackc.low %vm404_vm10, %vm403_vm9  ;;  %v347_v23 = vrot.slane %v3170_v19, %v346_v18  ;;  %v383_v31 = vrot.slane %v3170_v19, %v382_v24  ;;  %p2924_p1 = scmp.lt.s32.totalorder %s3613_s13, %s2922_s27 }
  0x22   : > { %2718 = vmatpush3.bf16.msk.msra.mxu0 %vm2580_vm5, %v3028_v12 }
  0x23   : > { %2719 = vmatprep.subr.bf16.mxu0 %v3027_v8  ;;  %2914 = vset.pattern.permute.xlu1 %v3029_v15 }
  0x24   : > { %2913 = vset.pattern.permute.xlu0 %v3029_v15  ;;  %377 = vperm.xlu1 %2914, %v331_v10  }
  0x25   : > { %373 = vperm.xlu0 %2913, %v330_v7  }
  0x26   : > { %2720 = vmatpush3.bf16.msk.msra.mxu0 %vm2582_vm8, %v3028_v12 }
  0x27   : > { %2721 = vmatprep.subr.bf16.mxu0 %v3027_v8 }
  0x28   : > { %2915 = vset.pattern.permute.xlu1 %v3031_v49 }
  0x29   : > { %2916 = vset.pattern.permute.xlu0 %v3031_v49 }
  0x2a   : > { %2722 = vmatpush3.bf16.msk.msra.mxu0 %vm2584_vm11, %v3028_v12 }
  0x2b   : > { %2741 = vmatprep.subr.mxu0 %v3027_v8 }
  0x96   : > { %v356_v20 = vpop.permute.xlu1 %355  ;;  %v337_v22 = vpop.permute.xlu0 %336 }
  0x97   : > { %v366_v25 = vsub.f32 %v356_v20, %v365_v21  ;;  %v348_v26 = vsub.f32 %v337_v22, %v347_v23 }
  0x99   : > { %v368_v32 = vmul.f32 %v366_v25, %v366_v25  ;;  %v350_v33 = vmul.f32 %v348_v26, %v348_v26 }
  0x9a   : > { %v360_v27 = vpop.permute.xlu1 %359 }
  0x9b   : > { %v342_v28 = vpop.permute.xlu0 %341  ;;  %v367_v29 = vsub.f32 %v360_v27, %v365_v21  ;;  %v370_v40 = vadd.f32 %v368_v32, %v350_v33 }
  0x9c   : > { %v349_v30 = vsub.f32 %v342_v28, %v347_v23 }
  0x9d   : > { %v369_v34 = vmul.f32 %v367_v29, %v367_v29 }
  0x9e   : > { %v351_v35 = vmul.f32 %v349_v30, %v349_v30 }
  0x9f   : > { %v378_v36 = vpop.permute.xlu1 %377 }
  0xa0   : > { %v374_v37 = vpop.permute.xlu0 %373  ;;  %v385_v38 = vsub.f32 %v378_v36, %v383_v31  ;;  %v371_v41 = vadd.f32 %v369_v34, %v351_v35  ;;  %v3293_v34 = vld [vmem:[%s327_s24] sm:$0xf]  ;;  %s2917_s24 = scalar_lea.vmem %s3613_s13, 384 }
  0xa1   : > { %v384_v39 = vsub.f32 %v374_v37, %v383_v31  ;;  %p2918_p12 = scmp.ne.s32.totalorder %s3613_s13, %s2917_s24 }
  0xa2   : > { %v387_v42 = vmul.f32 %v385_v38, %v385_v38 }
  0xa3   : > { %v386_v43 = vmul.f32 %v384_v39, %v384_v39  ;;  %p2919_p13 = pnand %p2918_p12, %p3107_p4 }
  0xa4   : > { %v3176_v44 = vadd.f32 %v387_v42, %v371_v41 }
  0xa5   : > { %v3178_v45 = vadd.f32 %v386_v43, %v370_v40  ;;  %p2920_p0 = pneg %p2919_p13 }
  0xa6   : > { %vm391_vm13 = vcmp.lt.f32.partialorder %v3176_v44, 0.1225 }
  0xa7   : > { %vm390_vm14 = vcmp.lt.f32.partialorder %v3178_v45, 0.1225  ;;  %v2577_v47 = vsel %vm391_vm13, 1.0, %v3027_v8 }
  0xa8   : > { %v2576_v46 = vsel %vm390_vm14, 1.0, %v3027_v8 }
  0xa9   : > { %v435_v48 = vpack.c.bf16 %v2577_v47, %v2576_v46 }
  0xab   : > { %2724 = vmatmul.mubr.msk.bf16.vlgmr.msra.gmra.mxu0 %vm436_vm15, %v435_v48 }
  0xac   : > { %2745 = vmatprep.mubr.msk.f32.mxu0 %vm3030_vm12, %v3027_v8 }
 0x16b   : > { %v3191_v50 = vpop.f32.mrf.mxu0 }
 0x16c   : > { %vm481_vm3 = vcmp.ge.f32.partialorder %v3191_v50, 1.0  ;;  %vm514_vm5 = vcmp.ge.f32.partialorder %v3191_v50, 2.0  ;;  %vm753_vm7 = vcmp.ge.f32.partialorder %v3191_v50, 3.0  ;;  %vm985_vm9 = vcmp.ge.f32.partialorder %v3191_v50, 4.0 }
 0x16d   : > { %v2725_v51 = vpop.f32.mrf.mxu0  ;;  %v494_v57 = vsel %vm481_vm3, 1, %v3026_v2  ;;  %v516_v59 = vsel %vm514_vm5, 1, %v3026_v2  ;;  %v755_v61 = vsel %vm753_vm7, 1, %v3026_v2  ;;  %v987_v63 = vsel %vm985_vm9, 1, %v3026_v2 }
 0x16e   : > { %vm1217_vm11 = vcmp.ge.f32.partialorder %v3191_v50, 5.0  ;;  %vm1681_vm3 = vcmp.ge.f32.partialorder %v3191_v50, 7.0  ;;  %vm2145_vm5 = vcmp.ge.f32.partialorder %v3191_v50, 9.0  ;;  %vm483_vm7 = vcmp.eq.s32.totalorder %v3129_v4, 0 }
 0x16f   : > { %v3193_v52 = vpop.f32.mrf.mxu0  ;;  %v1219_v1 = vsel %vm1217_vm11, 1, %v3026_v2  ;;  %v1683_v9 = vsel %vm1681_vm3, 1, %v3026_v2  ;;  %v2147_v11 = vsel %vm2145_vm5, 1, %v3026_v2  ;;  %v2587_v12 = vsel %vm483_vm7, 1.0, %v3027_v8 }
 0x170   : > { %vm515_vm0 = vcmp.ge.f32.partialorder %v3193_v52, 2.0  ;;  %vm482_vm1 = vcmp.ge.f32.partialorder %v3193_v52, 1.0  ;;  %vm754_vm2 = vcmp.ge.f32.partialorder %v3193_v52, 3.0  ;;  %vm986_vm4 = vcmp.ge.f32.partialorder %v3193_v52, 4.0 }
 0x171   : > { %v2726_v53 = vpop.f32.mrf.mxu0  ;;  %v517_v54 = vsel %vm515_vm0, 1, %v3026_v2  ;;  %v495_v55 = vsel %vm482_vm1, 1, %v3026_v2  ;;  %v756_v56 = vsel %vm754_vm2, 1, %v3026_v2  ;;  %v988_v58 = vsel %vm986_vm4, 1, %v3026_v2 }
 0x172   : > { %522 = vperm.xlu0 %2916, %v517_v54   ;;  %500 = vperm.xlu1 %2915, %v495_v55   ;;  %vm1218_vm6 = vcmp.ge.f32.partialorder %v3193_v52, 5.0  ;;  %vm1450_vm8 = vcmp.ge.f32.partialorder %v3193_v52, 6.0  ;;  %vm1682_vm10 = vcmp.ge.f32.partialorder %v3193_v52, 7.0  ;;  %vm1914_vm0 = vcmp.ge.f32.partialorder %v3193_v52, 8.0 }
 0x173   : > { %v1220_v60 = vsel %vm1218_vm6, 1, %v3026_v2  ;;  %v1452_v62 = vsel %vm1450_vm8, 1, %v3026_v2  ;;  %v1684_v0 = vsel %vm1682_vm10, 1, %v3026_v2  ;;  %vm1449_vm1 = vcmp.ge.f32.partialorder %v3191_v50, 6.0 }
 0x174   : > { %v1916_v5 = vsel %vm1914_vm0, 1, %v3026_v2  ;;  %v1451_v6 = vsel %vm1449_vm1, 1, %v3026_v2  ;;  %vm2146_vm2 = vcmp.ge.f32.partialorder %v3193_v52, 9.0  ;;  %vm1913_vm4 = vcmp.ge.f32.partialorder %v3191_v50, 8.0 }
 0x175   : > { %v2148_v7 = vsel %vm2146_vm2, 1, %v3026_v2  ;;  %v1915_v10 = vsel %vm1913_vm4, 1, %v3026_v2  ;;  %vm487_vm6 = vcmp.eq.f32.partialorder %v3193_v52, 1.0  ;;  %vm507_vm8 = vcmp.eq.f32.partialorder %v3193_v52, 2.0 }
 0x176   : > { %761 = vperm.xlu0 %2916, %v756_v56   ;;  %497 = vperm.xlu1 %2915, %v494_v57   ;;  %vm489_vm9 = vmand %vm391_vm13, %vm487_vm6  ;;  %vm746_vm10 = vcmp.eq.f32.partialorder %v3193_v52, 3.0  ;;  %vm486_vm3 = vcmp.eq.f32.partialorder %v3191_v50, 1.0  ;;  %vm506_vm4 = vcmp.eq.f32.partialorder %v3191_v50, 2.0 }
 0x177   : > { %vm509_vm11 = vmand %vm391_vm13, %vm507_vm8  ;;  %v2589_v2 = vsel %vm489_vm9, 1.0, %v3027_v8  ;;  %vm745_vm9 = vcmp.eq.f32.partialorder %v3191_v50, 3.0 }
 0x178   : > { %vm748_vm2 = vmand %vm391_vm13, %vm746_vm10  ;;  %v2591_v4 = vsel %vm509_vm11, 1.0, %v3027_v8 }
 0x179   : > { %v2599_v20 = vsel %vm748_vm2, 1.0, %v3027_v8  ;;  %vm488_vm6 = vmand %vm390_vm14, %vm486_vm3 }
 0x17a   : > { %993 = vperm.xlu0 %2916, %v988_v58   ;;  %519 = vperm.xlu1 %2915, %v516_v59   ;;  %vm508_vm8 = vmand %vm390_vm14, %vm506_vm4  ;;  %v2588_v22 = vsel %vm488_vm6, 1.0, %v3027_v8  ;;  %vm977_vm4 = vcmp.eq.f32.partialorder %v3191_v50, 4.0  ;;  %vm1210_vm6 = vcmp.eq.f32.partialorder %v3193_v52, 5.0 }
 0x17b   : > { %v2590_v25 = vsel %vm508_vm8, 1.0, %v3027_v8  ;;  %vm747_vm11 = vmand %vm390_vm14, %vm745_vm9 }
 0x17c   : > { %v2598_v29 = vsel %vm747_vm11, 1.0, %v3027_v8  ;;  %vm1212_vm8 = vmand %vm391_vm13, %vm1210_vm6  ;;  %vm1674_vm6 = vcmp.eq.f32.partialorder %v3193_v52, 7.0 }
 0x17d   : > { %v2615_v39 = vsel %vm1212_vm8, 1.0, %v3027_v8  ;;  %vm1676_vm8 = vmand %vm391_vm13, %vm1674_vm6  ;;  %vm2138_vm6 = vcmp.eq.f32.partialorder %v3193_v52, 9.0 }
 0x17e   : > { %1225 = vperm.xlu0 %2916, %v1220_v60   ;;  %758 = vperm.xlu1 %2915, %v755_v61   ;;  %v2631_v55 = vsel %vm1676_vm8, 1.0, %v3027_v8  ;;  %vm2140_vm8 = vmand %vm391_vm13, %vm2138_vm6 }
 0x17f   : > { %v2647_v44 = vsel %vm2140_vm8, 1.0, %v3027_v8 }
 0x182   : > { %1457 = vperm.xlu0 %2916, %v1452_v62   ;;  %990 = vperm.xlu1 %2915, %v987_v63  }
 0x186   : > { %1689 = vperm.xlu0 %2916, %v1684_v0   ;;  %1222 = vperm.xlu1 %2915, %v1219_v1  }
 0x18a   : > { %1921 = vperm.xlu0 %2916, %v1916_v5   ;;  %1454 = vperm.xlu1 %2915, %v1451_v6  }
 0x18e   : > { %2153 = vperm.xlu0 %2916, %v2148_v7   ;;  %1686 = vperm.xlu1 %2915, %v1683_v9   ;;  %v3460_v9 = vld [vmem:[%s323_s29] sm:$0x7]  ;;  %s2923_s29 = scalar_lea.vmem %s2922_s27, 768 }
 0x18f   : > { %p2925_p2 = scmp.lt.s32.totalorder %s2923_s29, %s2917_s24 }
 0x191   : > { %p2926_p3 = por %p2925_p2, %p2924_p1 }
 0x192   : > { %1918 = vperm.xlu1 %2915, %v1915_v10  }
 0x193   : > { %p2927_p5 = pnand %p2926_p3, %p2920_p0 }
 0x196   : > { %2150 = vperm.xlu1 %2915, %v2147_v11  }
 0x1ed   : > { %v523_v13 = vpop.permute.xlu0 %522  ;;  %v501_v14 = vpop.permute.xlu1 %500 }
 0x1ee   : > { %vm525_vm0 = vcmp.eq.s32.totalorder %v523_v13, 1  ;;  %vm503_vm1 = vcmp.eq.s32.totalorder %v501_v14, 1 }
 0x1ef   : > { %v3241_v15 = vsel %vm503_vm1, %v2589_v2, %v2587_v12 }
 0x1f0   : > { %v527_v16 = vsel %vm525_vm0, %v2591_v4, %v3241_v15  ;;  %vm978_vm0 = vcmp.eq.f32.partialorder %v3193_v52, 4.0 }
 0x1f1   : > { %v762_v17 = vpop.permute.xlu0 %761  ;;  %2728 = vmatpush3.xpose.msk.msra.mxu1 %vm436_vm15, %v527_v16  ;;  %v498_v18 = vpop.permute.xlu1 %497  ;;  %vm980_vm2 = vmand %vm391_vm13, %vm978_vm0  ;;  %vm1442_vm0 = vcmp.eq.f32.partialorder %v3193_v52, 6.0 }
 0x1f2   : > { %vm764_vm5 = vcmp.eq.s32.totalorder %v762_v17, 1  ;;  %2729 = vmatprep.subr.mxu1 %v3027_v8  ;;  %vm502_vm7 = vcmp.eq.s32.totalorder %v498_v18, 1  ;;  %v2607_v32 = vsel %vm980_vm2, 1.0, %v3027_v8  ;;  %vm1444_vm2 = vmand %vm391_vm13, %vm1442_vm0  ;;  %vm1906_vm0 = vcmp.eq.f32.partialorder %v3193_v52, 8.0 }
 0x1f3   : > { %v766_v21 = vsel %vm764_vm5, %v2599_v20, %v3241_v15  ;;  %v3261_v24 = vsel %vm502_vm7, %v2588_v22, %v2587_v12  ;;  %vm979_vm5 = vmand %vm390_vm14, %vm977_vm4  ;;  %vm1441_vm4 = vcmp.eq.f32.partialorder %v3191_v50, 6.0  ;;  %v2623_v47 = vsel %vm1444_vm2, 1.0, %v3027_v8 }
 0x1f4   : > { %2742 = vmatpush3.xpose.msk.msra.mxu0 %vm436_vm15, %v766_v21  ;;  %v2606_v36 = vsel %vm979_vm5, 1.0, %v3027_v8  ;;  %vm1443_vm5 = vmand %vm390_vm14, %vm1441_vm4  ;;  %vm1905_vm4 = vcmp.eq.f32.partialorder %v3191_v50, 8.0 }
 0x1f5   : > { %v520_v23 = vpop.permute.xlu1 %519  ;;  %2743 = vmatprep.subr.mxu0 %v3027_v8  ;;  %v994_v27 = vpop.permute.xlu0 %993  ;;  %v2622_v51 = vsel %vm1443_vm5, 1.0, %v3027_v8  ;;  %vm1908_vm2 = vmand %vm391_vm13, %vm1906_vm0 }
 0x1f6   : > { %vm524_vm10 = vcmp.eq.s32.totalorder %v520_v23, 1  ;;  %vm996_vm3 = vcmp.eq.s32.totalorder %v994_v27, 1  ;;  %v2639_v61 = vsel %vm1908_vm2, 1.0, %v3027_v8  ;;  %vm1907_vm5 = vmand %vm390_vm14, %vm1905_vm4 }
 0x1f7   : > { %v526_v26 = vsel %vm524_vm10, %v2590_v25, %v3261_v24  ;;  %v998_v33 = vsel %vm996_vm3, %v2607_v32, %v3241_v15  ;;  %vm1209_vm10 = vcmp.eq.f32.partialorder %v3191_v50, 5.0  ;;  %v2638_v0 = vsel %vm1907_vm5, 1.0, %v3027_v8 }
 0x1f8   : > { %2730 = vmatpush3.xpose.msk.msra.mxu1 %vm436_vm15, %v526_v26  ;;  %vm1211_vm11 = vmand %vm390_vm14, %vm1209_vm10  ;;  %vm1673_vm10 = vcmp.eq.f32.partialorder %v3191_v50, 7.0 }
 0x1f9   : > { %v759_v28 = vpop.permute.xlu1 %758  ;;  %2734 = vmatprep.subr.mxu1 %v3027_v8  ;;  %v1226_v35 = vpop.permute.xlu0 %1225  ;;  %v2614_v42 = vsel %vm1211_vm11, 1.0, %v3027_v8  ;;  %vm1675_vm11 = vmand %vm390_vm14, %vm1673_vm10  ;;  %vm2137_vm10 = vcmp.eq.f32.partialorder %v3191_v50, 9.0 }
 0x1fa   : > { %vm763_vm1 = vcmp.eq.s32.totalorder %v759_v28, 1  ;;  %vm1228_vm9 = vcmp.eq.s32.totalorder %v1226_v35, 1  ;;  %v2630_v58 = vsel %vm1675_vm11, 1.0, %v3027_v8  ;;  %vm2139_vm13 = vmand %vm390_vm14, %vm2137_vm10 }
 0x1fb   : > { %v765_v30 = vsel %vm763_vm1, %v2598_v29, %v3261_v24  ;;  %2732 = vmatmul.mubr.msk.f32.vlgmr.msra.gmra.mxu1 %vm436_vm15, %v3170_v19  ;;  %v1230_v40 = vsel %vm1228_vm9, %v2615_v39, %v3241_v15  ;;  %v2646_v50 = vsel %vm2139_vm13, 1.0, %v3027_v8 }
 0x1fc   : > { %2735 = vmatpush3.xpose.msk.msra.mxu1 %vm436_vm15, %v527_v16  ;;  %2744 = vmatpush3.xpose.msk.msra.mxu0 %vm436_vm15, %v765_v30 }
 0x1fd   : > { %v991_v31 = vpop.permute.xlu1 %990  ;;  %2736 = vmatprep.subr.mxu1 %v3027_v8  ;;  %2755 = vmatprep.subr.mxu0 %v3027_v8  ;;  %v1458_v41 = vpop.permute.xlu0 %1457 }
 0x1fe   : > { %2738 = vmatprep.mubr.msk.f32.mxu1 %vm3030_vm12, %v3027_v8  ;;  %vm995_vm7 = vcmp.eq.s32.totalorder %v991_v31, 1  ;;  %vm1460_vm3 = vcmp.eq.s32.totalorder %v1458_v41, 1 }
 0x1ff   : > { %2746 = vmatmul.mubr.msk.f32.vlgmr.msra.gmra.mxu0 %vm436_vm15, %v3170_v19  ;;  %v997_v37 = vsel %vm995_vm7, %v2606_v36, %v3261_v24  ;;  %v1462_v48 = vsel %vm1460_vm3, %v2623_v47, %v3241_v15 }
 0x200   : > { %2737 = vmatpush3.xpose.msk.msra.mxu1 %vm436_vm15, %v526_v26  ;;  %2756 = vmatpush3.xpose.msk.msra.mxu0 %vm436_vm15, %v998_v33 }
 0x201   : > { %2748 = vmatprep.subr.mxu1 %v3027_v8  ;;  %2757 = vmatprep.subr.mxu0 %v3027_v8  ;;  %v1223_v38 = vpop.permute.xlu1 %1222  ;;  %v1690_v49 = vpop.permute.xlu0 %1689 }
 0x202   : > { %2759 = vmatprep.mubr.msk.f32.mxu0 %vm3030_vm12, %v3027_v8  ;;  %vm1227_vm1 = vcmp.eq.s32.totalorder %v1223_v38, 1  ;;  %vm1692_vm9 = vcmp.eq.s32.totalorder %v1690_v49, 1 }
 0x203   : > { %2739 = vmatmul.mubr.msk.f32.vlgmr.msra.gmra.mxu1 %vm436_vm15, %v3293_v34  ;;  %v1229_v43 = vsel %vm1227_vm1, %v2614_v42, %v3261_v24  ;;  %v1694_v56 = vsel %vm1692_vm9, %v2631_v55, %v3241_v15 }
 0x204   : > { %2749 = vmatpush3.xpose.msk.msra.mxu1 %vm436_vm15, %v766_v21  ;;  %2758 = vmatpush3.xpose.msk.msra.mxu0 %vm436_vm15, %v997_v37 }
 0x205   : > { %2750 = vmatprep.subr.mxu1 %v3027_v8  ;;  %2769 = vmatprep.subr.mxu0 %v3027_v8  ;;  %v1455_v46 = vpop.permute.xlu1 %1454  ;;  %v1922_v57 = vpop.permute.xlu0 %1921 }
 0x206   : > { %2752 = vmatprep.mubr.msk.f32.mxu1 %vm3030_vm12, %v3027_v8  ;;  %vm1459_vm7 = vcmp.eq.s32.totalorder %v1455_v46, 1  ;;  %vm1924_vm3 = vcmp.eq.s32.totalorder %v1922_v57, 1 }
 0x207   : > { %2760 = vmatmul.mubr.msk.f32.vlgmr.msra.gmra.mxu0 %vm436_vm15, %v3170_v19  ;;  %v1461_v53 = vsel %vm1459_vm7, %v2622_v51, %v3261_v24  ;;  %v1926_v62 = vsel %vm1924_vm3, %v2639_v61, %v3241_v15 }
 0x208   : > { %2751 = vmatpush3.xpose.msk.msra.mxu1 %vm436_vm15, %v765_v30  ;;  %2770 = vmatpush3.xpose.msk.msra.mxu0 %vm436_vm15, %v1230_v40 }
 0x209   : > { %2762 = vmatprep.subr.mxu1 %v3027_v8  ;;  %2771 = vmatprep.subr.mxu0 %v3027_v8  ;;  %v1687_v54 = vpop.permute.xlu1 %1686  ;;  %v2154_v63 = vpop.permute.xlu0 %2153 }
 0x20a   : > { %2773 = vmatprep.mubr.msk.f32.mxu0 %vm3030_vm12, %v3027_v8  ;;  %vm1691_vm1 = vcmp.eq.s32.totalorder %v1687_v54, 1  ;;  %vm2156_vm9 = vcmp.eq.s32.totalorder %v2154_v63, 1 }
 0x20b   : > { %2753 = vmatmul.mubr.msk.f32.vlgmr.msra.gmra.mxu1 %vm436_vm15, %v3293_v34  ;;  %v1693_v59 = vsel %vm1691_vm1, %v2630_v58, %v3261_v24  ;;  %v2158_v5 = vsel %vm2156_vm9, %v2647_v44, %v3241_v15 }
 0x20c   : > { %2763 = vmatpush3.xpose.msk.msra.mxu1 %vm436_vm15, %v998_v33  ;;  %2772 = vmatpush3.xpose.msk.msra.mxu0 %vm436_vm15, %v1229_v43 }
 0x20d   : > { %2764 = vmatprep.subr.mxu1 %v3027_v8  ;;  %2783 = vmatprep.subr.mxu0 %v3027_v8  ;;  %v1919_v60 = vpop.permute.xlu1 %1918 }
 0x20e   : > { %2766 = vmatprep.mubr.msk.f32.mxu1 %vm3030_vm12, %v3027_v8  ;;  %vm1923_vm7 = vcmp.eq.s32.totalorder %v1919_v60, 1 }
 0x20f   : > { %2774 = vmatmul.mubr.msk.f32.vlgmr.msra.gmra.mxu0 %vm436_vm15, %v3170_v19  ;;  %v1925_v52 = vsel %vm1923_vm7, %v2638_v0, %v3261_v24 }
 0x210   : > { %2765 = vmatpush3.xpose.msk.msra.mxu1 %vm436_vm15, %v997_v37  ;;  %2784 = vmatpush3.xpose.msk.msra.mxu0 %vm436_vm15, %v1462_v48 }
 0x211   : > { %2776 = vmatprep.subr.mxu1 %v3027_v8  ;;  %2785 = vmatprep.subr.mxu0 %v3027_v8  ;;  %v2151_v1 = vpop.permute.xlu1 %2150 }
 0x212   : > { %2787 = vmatprep.mubr.msk.f32.mxu0 %vm3030_vm12, %v3027_v8  ;;  %vm2155_vm11 = vcmp.eq.s32.totalorder %v2151_v1, 1 }
 0x213   : > { %2767 = vmatmul.mubr.msk.f32.vlgmr.msra.gmra.mxu1 %vm436_vm15, %v3293_v34  ;;  %v2157_v45 = vsel %vm2155_vm11, %v2646_v50, %v3261_v24 }
 0x214   : > { %2777 = vmatpush3.xpose.msk.msra.mxu1 %vm436_vm15, %v1230_v40  ;;  %2786 = vmatpush3.xpose.msk.msra.mxu0 %vm436_vm15, %v1461_v53 }
 0x215   : > { %2778 = vmatprep.subr.mxu1 %v3027_v8  ;;  %2797 = vmatprep.subr.mxu0 %v3027_v8 }
 0x216   : > { %2780 = vmatprep.mubr.msk.f32.mxu1 %vm3030_vm12, %v3027_v8 }
 0x217   : > { %2788 = vmatmul.mubr.msk.f32.vlgmr.msra.gmra.mxu0 %vm436_vm15, %v3170_v19 }
 0x218   : > { %2779 = vmatpush3.xpose.msk.msra.mxu1 %vm436_vm15, %v1229_v43  ;;  %2798 = vmatpush3.xpose.msk.msra.mxu0 %vm436_vm15, %v1694_v56 }
 0x219   : > { %2790 = vmatprep.subr.mxu1 %v3027_v8  ;;  %2799 = vmatprep.subr.mxu0 %v3027_v8 }
 0x21a   : > { %2801 = vmatprep.mubr.msk.f32.mxu0 %vm3030_vm12, %v3027_v8 }
 0x21b   : > { %2781 = vmatmul.mubr.msk.f32.vlgmr.msra.gmra.mxu1 %vm436_vm15, %v3293_v34 }
 0x21c   : > { %2791 = vmatpush3.xpose.msk.msra.mxu1 %vm436_vm15, %v1462_v48  ;;  %2800 = vmatpush3.xpose.msk.msra.mxu0 %vm436_vm15, %v1693_v59 }
 0x21d   : > { %2792 = vmatprep.subr.mxu1 %v3027_v8  ;;  %2811 = vmatprep.subr.mxu0 %v3027_v8 }
 0x21e   : > { %2794 = vmatprep.mubr.msk.f32.mxu1 %vm3030_vm12, %v3027_v8 }
 0x21f   : > { %2802 = vmatmul.mubr.msk.f32.vlgmr.msra.gmra.mxu0 %vm436_vm15, %v3170_v19 }
 0x220   : > { %2793 = vmatpush3.xpose.msk.msra.mxu1 %vm436_vm15, %v1461_v53  ;;  %2812 = vmatpush3.xpose.msk.msra.mxu0 %vm436_vm15, %v1926_v62 }
 0x221   : > { %2804 = vmatprep.subr.mxu1 %v3027_v8  ;;  %2813 = vmatprep.subr.mxu0 %v3027_v8 }
 0x222   : > { %2815 = vmatprep.mubr.msk.f32.mxu0 %vm3030_vm12, %v3027_v8 }
 0x223   : > { %2795 = vmatmul.mubr.msk.f32.vlgmr.msra.gmra.mxu1 %vm436_vm15, %v3293_v34 }
 0x224   : > { %2805 = vmatpush3.xpose.msk.msra.mxu1 %vm436_vm15, %v1694_v56  ;;  %2814 = vmatpush3.xpose.msk.msra.mxu0 %vm436_vm15, %v1925_v52 }
 0x225   : > { %2806 = vmatprep.subr.mxu1 %v3027_v8  ;;  %2825 = vmatprep.subr.mxu0 %v3027_v8 }
 0x226   : > { %2808 = vmatprep.mubr.msk.f32.mxu1 %vm3030_vm12, %v3027_v8 }
 0x227   : > { %2816 = vmatmul.mubr.msk.f32.vlgmr.msra.gmra.mxu0 %vm436_vm15, %v3170_v19 }
 0x228   : > { %2807 = vmatpush3.xpose.msk.msra.mxu1 %vm436_vm15, %v1693_v59  ;;  %2826 = vmatpush3.xpose.msk.msra.mxu0 %vm436_vm15, %v2158_v5 }
 0x229   : > { %2818 = vmatprep.subr.mxu1 %v3027_v8  ;;  %2827 = vmatprep.subr.mxu0 %v3027_v8 }
 0x22a   : > { %2829 = vmatprep.mubr.msk.f32.mxu0 %vm3030_vm12, %v3027_v8 }
 0x22b   : > { %2809 = vmatmul.mubr.msk.f32.vlgmr.msra.gmra.mxu1 %vm436_vm15, %v3293_v34 }
 0x22c   : > { %2819 = vmatpush3.xpose.msk.msra.mxu1 %vm436_vm15, %v1926_v62  ;;  %2828 = vmatpush3.xpose.msk.msra.mxu0 %vm436_vm15, %v2157_v45 }
 0x22d   : > { %2820 = vmatprep.subr.mxu1 %v3027_v8  ;;  %2822 = vmatprep.mubr.msk.f32.mxu1 %vm3030_vm12, %v3027_v8 }
 0x22f   : > { %2830 = vmatmul.mubr.msk.f32.vlgmr.msra.gmra.mxu0 %vm436_vm15, %v3170_v19  ;;  %v3032_v19 = vmov 1966171168  }
 0x230   : > { %2821 = vmatpush3.xpose.msk.msra.mxu1 %vm436_vm15, %v1925_v52  ;;  %v683_v6 = vunpack.c.l.s4 %v3032_v19 }
 0x231   : > { %2832 = vmatprep.subr.mxu1 %v3027_v8 }
 0x232   : > { %v684_v7 = vunpack.c.0.s8 %v683_v6 }
 0x233   : > { %2823 = vmatmul.mubr.msk.f32.vlgmr.msra.gmra.mxu1 %vm436_vm15, %v3293_v34 }
 0x234   : > { %2833 = vmatpush3.xpose.msk.msra.mxu1 %vm436_vm15, %v2158_v5  ;;  %2836 = vmatprep.mubr.msk.f32.mxu1 %vm3030_vm12, %v3027_v8  ;;  %v3463_v10 = vsub.s32 %v684_v7, %v3127_v3  ;;  %vm708_vm12 = vcmask 122880  }
 0x235   : > { %2834 = vmatprep.subr.mxu1 %v3027_v8 }
 0x238   : > { %2835 = vmatpush3.xpose.msk.msra.mxu1 %vm436_vm15, %v2157_v45 }
 0x23b   : > { %2837 = vmatmul.mubr.msk.f32.vlgmr.msra.gmra.mxu1 %vm436_vm15, %v3293_v34 }
 0x2bb   : > { %v603_v8 = vpop.f32.mrf.mxu1 }
 0x2bc   : > { %v680_v11 = vsub.f32 %v603_v8, %v3460_v9 }
 0x2bd   : > { %v2733_v12 = vpop.f32.mrf.mxu1 }
 0x2be   : > { %v688_v13 = vrot.slane %v680_v11, %v3463_v10 }
 0x2bf   : > { %v839_v14 = vpop.f32.mrf.mxu0 }
 0x2c0   : > { %v689_v2 = vcombine.high %v688_v13, %v688_v13  ;;  %v696_v15 = vrot.slane %v688_v13, %v3463_v10  ;;  %v913_v4 = vsub.f32 %v839_v14, %v3460_v9 }
 0x2c1   : > { %v2747_v16 = vpop.f32.mrf.mxu0 }
 0x2c2   : > { %v703_v17 = vrot.slane %v689_v2, %v3463_v10  ;;  %v704_v3 = vcombine.high %v696_v15, %v696_v15  ;;  %709 = vst.msk [vmem:[%s3471_s9] sm:$0x1] %vm708_vm12, %v696_v15  ;;  %v921_v18 = vrot.slane %v913_v4, %v3463_v10 }
 0x2c3   : > { %v676_v20 = vpop.f32.mrf.mxu1 }
 0x2c4   : > { %710 = vst.msk [vmem:[%s3471_s9 + $0x8] sm:$0x1] %vm708_vm12, %v703_v17  ;;  %711 = vst.msk [vmem:[%s3471_s9 + $0x10] sm:$0x1] %vm708_vm12, %v704_v3  ;;  %v719_v21 = vrot.slane %v676_v20, %v3463_v10  ;;  %v922_v22 = vcombine.high %v921_v18, %v921_v18  ;;  %v929_v23 = vrot.slane %v921_v18, %v3463_v10 }
 0x2c5   : > { %v2740_v24 = vpop.f32.mrf.mxu1 }
 0x2c6   : > { %v720_v25 = vcombine.high %v719_v21, %v719_v21  ;;  %v727_v26 = vrot.slane %v719_v21, %v3463_v10  ;;  %v936_v27 = vrot.slane %v922_v22, %v3463_v10  ;;  %v937_v28 = vcombine.high %v929_v23, %v929_v23  ;;  %941 = vst.msk [vmem:[%s3471_s9 + $0x1] sm:$0x1] %vm708_vm12, %v929_v23 }
 0x2c7   : > { %v1071_v29 = vpop.f32.mrf.mxu0 }
 0x2c8   : > { %v734_v30 = vrot.slane %v720_v25, %v3463_v10  ;;  %v735_v31 = vcombine.high %v727_v26, %v727_v26  ;;  %741 = vst.msk [vmem:[%s3488_s11] sm:$0x1] %vm708_vm12, %v727_v26  ;;  %942 = vst.msk [vmem:[%s3471_s9 + $0x9] sm:$0x1] %vm708_vm12, %v936_v27  ;;  %v1145_v32 = vsub.f32 %v1071_v29, %v3460_v9 }
 0x2c9   : > { %943 = vst.msk [vmem:[%s3471_s9 + $0x11] sm:$0x1] %vm708_vm12, %v937_v28  ;;  %v2761_v33 = vpop.f32.mrf.mxu0 }
 0x2ca   : > { %v736_v34 = vcombine.high %v734_v30, %v734_v30  ;;  %742 = vst.msk [vmem:[%s3488_s11 + $0x8] sm:$0x1] %vm708_vm12, %v734_v30  ;;  %743 = vst.msk [vmem:[%s3488_s11 + $0x10] sm:$0x1] %vm708_vm12, %v735_v31  ;;  %v1153_v35 = vrot.slane %v1145_v32, %v3463_v10 }
 0x2cb   : > { %v909_v36 = vpop.f32.mrf.mxu1 }
 0x2cc   : > { %744 = vst.msk [vmem:[%s3488_s11 + $0x18] sm:$0x1] %vm708_vm12, %v736_v34  ;;  %v951_v37 = vrot.slane %v909_v36, %v3463_v10  ;;  %v1154_v38 = vcombine.high %v1153_v35, %v1153_v35  ;;  %v1161_v39 = vrot.slane %v1153_v35, %v3463_v10 }
 0x2cd   : > { %v2754_v40 = vpop.f32.mrf.mxu1 }
 0x2ce   : > { %v952_v41 = vcombine.high %v951_v37, %v951_v37  ;;  %v959_v42 = vrot.slane %v951_v37, %v3463_v10  ;;  %v1168_v43 = vrot.slane %v1154_v38, %v3463_v10  ;;  %v1169_v46 = vcombine.high %v1161_v39, %v1161_v39  ;;  %1173 = vst.msk [vmem:[%s3471_s9 + $0x2] sm:$0x1] %vm708_vm12, %v1161_v39 }
 0x2cf   : > { %v1303_v47 = vpop.f32.mrf.mxu0 }
 0x2d0   : > { %v966_v48 = vrot.slane %v952_v41, %v3463_v10  ;;  %v967_v49 = vcombine.high %v959_v42, %v959_v42  ;;  %973 = vst.msk [vmem:[%s3488_s11 + $0x1] sm:$0x1] %vm708_vm12, %v959_v42  ;;  %1174 = vst.msk [vmem:[%s3471_s9 + $0xa] sm:$0x1] %vm708_vm12, %v1168_v43  ;;  %v1377_v51 = vsub.f32 %v1303_v47, %v3460_v9 }
 0x2d1   : > { %1175 = vst.msk [vmem:[%s3471_s9 + $0x12] sm:$0x1] %vm708_vm12, %v1169_v46  ;;  %v2775_v53 = vpop.f32.mrf.mxu0 }
 0x2d2   : > { %v968_v54 = vcombine.high %v966_v48, %v966_v48  ;;  %974 = vst.msk [vmem:[%s3488_s11 + $0x9] sm:$0x1] %vm708_vm12, %v966_v48  ;;  %975 = vst.msk [vmem:[%s3488_s11 + $0x11] sm:$0x1] %vm708_vm12, %v967_v49  ;;  %v1385_v55 = vrot.slane %v1377_v51, %v3463_v10 }
 0x2d3   : > { %v1141_v56 = vpop.f32.mrf.mxu1 }
 0x2d4   : > { %976 = vst.msk [vmem:[%s3488_s11 + $0x19] sm:$0x1] %vm708_vm12, %v968_v54  ;;  %v1183_v57 = vrot.slane %v1141_v56, %v3463_v10  ;;  %v1386_v58 = vcombine.high %v1385_v55, %v1385_v55  ;;  %v1393_v59 = vrot.slane %v1385_v55, %v3463_v10 }
 0x2d5   : > { %v2768_v60 = vpop.f32.mrf.mxu1 }
 0x2d6   : > { %v1184_v61 = vcombine.high %v1183_v57, %v1183_v57  ;;  %v1191_v62 = vrot.slane %v1183_v57, %v3463_v10  ;;  %v1400_v63 = vrot.slane %v1386_v58, %v3463_v10  ;;  %v1401_v0 = vcombine.high %v1393_v59, %v1393_v59  ;;  %1405 = vst.msk [vmem:[%s3471_s9 + $0x3] sm:$0x1] %vm708_vm12, %v1393_v59 }
 0x2d7   : > { %v1535_v52 = vpop.f32.mrf.mxu0 }
 0x2d8   : > { %v1198_v1 = vrot.slane %v1184_v61, %v3463_v10  ;;  %v1199_v44 = vcombine.high %v1191_v62, %v1191_v62  ;;  %1205 = vst.msk [vmem:[%s3488_s11 + $0x2] sm:$0x1] %vm708_vm12, %v1191_v62  ;;  %1406 = vst.msk [vmem:[%s3471_s9 + $0xb] sm:$0x1] %vm708_vm12, %v1400_v63  ;;  %v1609_v5 = vsub.f32 %v1535_v52, %v3460_v9 }
 0x2d9   : > { %1407 = vst.msk [vmem:[%s3471_s9 + $0x13] sm:$0x1] %vm708_vm12, %v1401_v0  ;;  %v2789_v50 = vpop.f32.mrf.mxu0 }
 0x2da   : > { %v1200_v45 = vcombine.high %v1198_v1, %v1198_v1  ;;  %1206 = vst.msk [vmem:[%s3488_s11 + $0xa] sm:$0x1] %vm708_vm12, %v1198_v1  ;;  %1207 = vst.msk [vmem:[%s3488_s11 + $0x12] sm:$0x1] %vm708_vm12, %v1199_v44  ;;  %v1617_v19 = vrot.slane %v1609_v5, %v3463_v10 }
 0x2db   : > { %v1373_v6 = vpop.f32.mrf.mxu1 }
 0x2dc   : > { %1208 = vst.msk [vmem:[%s3488_s11 + $0x1a] sm:$0x1] %vm708_vm12, %v1200_v45  ;;  %v1415_v7 = vrot.slane %v1373_v6, %v3463_v10  ;;  %v1618_v8 = vcombine.high %v1617_v19, %v1617_v19  ;;  %v1625_v11 = vrot.slane %v1617_v19, %v3463_v10 }
 0x2dd   : > { %v2782_v12 = vpop.f32.mrf.mxu1 }
 0x2de   : > { %v1416_v13 = vcombine.high %v1415_v7, %v1415_v7  ;;  %v1423_v14 = vrot.slane %v1415_v7, %v3463_v10  ;;  %v1632_v2 = vrot.slane %v1618_v8, %v3463_v10  ;;  %v1633_v15 = vcombine.high %v1625_v11, %v1625_v11  ;;  %1637 = vst.msk [vmem:[%s3471_s9 + $0x4] sm:$0x1] %vm708_vm12, %v1625_v11 }
 0x2df   : > { %v1767_v4 = vpop.f32.mrf.mxu0 }
 0x2e0   : > { %v1430_v16 = vrot.slane %v1416_v13, %v3463_v10  ;;  %v1431_v17 = vcombine.high %v1423_v14, %v1423_v14  ;;  %1437 = vst.msk [vmem:[%s3488_s11 + $0x3] sm:$0x1] %vm708_vm12, %v1423_v14  ;;  %1638 = vst.msk [vmem:[%s3471_s9 + $0xc] sm:$0x1] %vm708_vm12, %v1632_v2  ;;  %v1841_v3 = vsub.f32 %v1767_v4, %v3460_v9 }
 0x2e1   : > { %1639 = vst.msk [vmem:[%s3471_s9 + $0x14] sm:$0x1] %vm708_vm12, %v1633_v15  ;;  %v2803_v18 = vpop.f32.mrf.mxu0 }
 0x2e2   : > { %v1432_v20 = vcombine.high %v1430_v16, %v1430_v16  ;;  %1438 = vst.msk [vmem:[%s3488_s11 + $0xb] sm:$0x1] %vm708_vm12, %v1430_v16  ;;  %1439 = vst.msk [vmem:[%s3488_s11 + $0x13] sm:$0x1] %vm708_vm12, %v1431_v17  ;;  %v1849_v21 = vrot.slane %v1841_v3, %v3463_v10 }
 0x2e3   : > { %v1605_v22 = vpop.f32.mrf.mxu1 }
 0x2e4   : > { %1440 = vst.msk [vmem:[%s3488_s11 + $0x1b] sm:$0x1] %vm708_vm12, %v1432_v20  ;;  %v1647_v23 = vrot.slane %v1605_v22, %v3463_v10  ;;  %v1850_v24 = vcombine.high %v1849_v21, %v1849_v21  ;;  %v1857_v25 = vrot.slane %v1849_v21, %v3463_v10 }
 0x2e5   : > { %v2796_v26 = vpop.f32.mrf.mxu1 }
 0x2e6   : > { %v1648_v27 = vcombine.high %v1647_v23, %v1647_v23  ;;  %v1655_v28 = vrot.slane %v1647_v23, %v3463_v10  ;;  %v1864_v29 = vrot.slane %v1850_v24, %v3463_v10  ;;  %v1865_v30 = vcombine.high %v1857_v25, %v1857_v25  ;;  %1869 = vst.msk [vmem:[%s3471_s9 + $0x5] sm:$0x1] %vm708_vm12, %v1857_v25 }
 0x2e7   : > { %v1999_v31 = vpop.f32.mrf.mxu0 }
 0x2e8   : > { %v1662_v32 = vrot.slane %v1648_v27, %v3463_v10  ;;  %v1663_v33 = vcombine.high %v1655_v28, %v1655_v28  ;;  %1669 = vst.msk [vmem:[%s3488_s11 + $0x4] sm:$0x1] %vm708_vm12, %v1655_v28  ;;  %1870 = vst.msk [vmem:[%s3471_s9 + $0xd] sm:$0x1] %vm708_vm12, %v1864_v29  ;;  %v2073_v34 = vsub.f32 %v1999_v31, %v3460_v9 }
 0x2e9   : > { %1871 = vst.msk [vmem:[%s3471_s9 + $0x15] sm:$0x1] %vm708_vm12, %v1865_v30  ;;  %v2817_v35 = vpop.f32.mrf.mxu0 }
 0x2ea   : > { %v1664_v36 = vcombine.high %v1662_v32, %v1662_v32  ;;  %1670 = vst.msk [vmem:[%s3488_s11 + $0xc] sm:$0x1] %vm708_vm12, %v1662_v32  ;;  %1671 = vst.msk [vmem:[%s3488_s11 + $0x14] sm:$0x1] %vm708_vm12, %v1663_v33  ;;  %v2081_v37 = vrot.slane %v2073_v34, %v3463_v10 }
 0x2eb   : > { %v1837_v38 = vpop.f32.mrf.mxu1 }
 0x2ec   : > { %1672 = vst.msk [vmem:[%s3488_s11 + $0x1c] sm:$0x1] %vm708_vm12, %v1664_v36  ;;  %v1879_v39 = vrot.slane %v1837_v38, %v3463_v10  ;;  %v2082_v40 = vcombine.high %v2081_v37, %v2081_v37  ;;  %v2089_v41 = vrot.slane %v2081_v37, %v3463_v10 }
 0x2ed   : > { %v2810_v42 = vpop.f32.mrf.mxu1 }
 0x2ee   : > { %v1880_v43 = vcombine.high %v1879_v39, %v1879_v39  ;;  %v1887_v46 = vrot.slane %v1879_v39, %v3463_v10  ;;  %v2096_v47 = vrot.slane %v2082_v40, %v3463_v10  ;;  %v2097_v48 = vcombine.high %v2089_v41, %v2089_v41  ;;  %2101 = vst.msk [vmem:[%s3471_s9 + $0x6] sm:$0x1] %vm708_vm12, %v2089_v41 }
 0x2ef   : > { %v2231_v49 = vpop.f32.mrf.mxu0 }
 0x2f0   : > { %v1894_v51 = vrot.slane %v1880_v43, %v3463_v10  ;;  %v1895_v53 = vcombine.high %v1887_v46, %v1887_v46  ;;  %1901 = vst.msk [vmem:[%s3488_s11 + $0x5] sm:$0x1] %vm708_vm12, %v1887_v46  ;;  %2102 = vst.msk [vmem:[%s3471_s9 + $0xe] sm:$0x1] %vm708_vm12, %v2096_v47  ;;  %v2305_v54 = vsub.f32 %v2231_v49, %v3460_v9 }
 0x2f1   : > { %2103 = vst.msk [vmem:[%s3471_s9 + $0x16] sm:$0x1] %vm708_vm12, %v2097_v48  ;;  %v2831_v55 = vpop.f32.mrf.mxu0 }
 0x2f2   : > { %v1896_v56 = vcombine.high %v1894_v51, %v1894_v51  ;;  %1902 = vst.msk [vmem:[%s3488_s11 + $0xd] sm:$0x1] %vm708_vm12, %v1894_v51  ;;  %1903 = vst.msk [vmem:[%s3488_s11 + $0x15] sm:$0x1] %vm708_vm12, %v1895_v53  ;;  %v2313_v57 = vrot.slane %v2305_v54, %v3463_v10 }
 0x2f3   : > { %v2069_v58 = vpop.f32.mrf.mxu1 }
 0x2f4   : > { %1904 = vst.msk [vmem:[%s3488_s11 + $0x1d] sm:$0x1] %vm708_vm12, %v1896_v56  ;;  %v2111_v59 = vrot.slane %v2069_v58, %v3463_v10  ;;  %v2314_v9 = vcombine.high %v2313_v57, %v2313_v57  ;;  %v2321_v60 = vrot.slane %v2313_v57, %v3463_v10 }
 0x2f5   : > { %v2824_v61 = vpop.f32.mrf.mxu1 }
 0x2f6   : > { %v2112_v62 = vcombine.high %v2111_v59, %v2111_v59  ;;  %v2119_v63 = vrot.slane %v2111_v59, %v3463_v10  ;;  %v2328_v0 = vrot.slane %v2314_v9, %v3463_v10  ;;  %v2329_v52 = vcombine.high %v2321_v60, %v2321_v60  ;;  %2333 = vst.msk [vmem:[%s3471_s9 + $0x7] sm:$0x1] %vm708_vm12, %v2321_v60 }
 0x2f8   : > { %v2126_v1 = vrot.slane %v2112_v62, %v3463_v10  ;;  %v2127_v44 = vcombine.high %v2119_v63, %v2119_v63  ;;  %2133 = vst.msk [vmem:[%s3488_s11 + $0x6] sm:$0x1] %vm708_vm12, %v2119_v63  ;;  %2334 = vst.msk [vmem:[%s3471_s9 + $0xf] sm:$0x1] %vm708_vm12, %v2328_v0 }
 0x2f9   : > { %2335 = vst.msk [vmem:[%s3471_s9 + $0x17] sm:$0x1] %vm708_vm12, %v2329_v52 }
 0x2fa   : > { %2930 = shalt.err (!%p2927_p5)
}
 0x2fb   : > { %s2931_s8 = scalar_lea.hbm %s3622_s16, 384  ;;  %s2935_s12 = scalar_lea.hbm %s3733_s4, 768 }
 0x2fc   : > { %p2932_p6 = scmp.ne.s32.totalorder %s3622_s16, %s2931_s8  ;;  %p2936_p10 = scmp.lt.s32.totalorder %s3622_s16, %s3733_s4 }
 0x2fd   : > { %p2937_p11 = scmp.lt.s32.totalorder %s2935_s12, %s2931_s8 }
 0x2fe   : > { %p2933_p7 = pnand %p2932_p6, %p3107_p4 }
 0x2ff   : > { %p2938_p12 = por %p2937_p11, %p2936_p10 }
 0x300   : > { %p2934_p9 = pneg %p2933_p7 }
 0x302   : > { %p2939_p13 = pnand %p2938_p12, %p2934_p9 }
 0x304   : > { %2942 = shalt.err (!%p2939_p13)
}
 0x305   : > { %s3034_s24 = smov 128   ;;  %s3035_s25 = smov 8   ;;  %v2128_v5 = vcombine.high %v2126_v1, %v2126_v1  ;;  %2134 = vst.msk [vmem:[%s3488_s11 + $0xe] sm:$0x1] %vm708_vm12, %v2126_v1  ;;  %2135 = vst.msk [vmem:[%s3488_s11 + $0x16] sm:$0x1] %vm708_vm12, %v2127_v44  ;;  %v2301_v50 = vpop.f32.mrf.mxu1 }
 0x306   : > { %2841 = dma.vmem_to_hbm [thread:$0]  (%p3107_p4), %s3613_s13, 384, %s3622_s16, %s2370_s17, %s3034_s24, %s3034_s24, %s3035_s25   ;;  %v2343_v45 = vrot.slane %v2301_v50, %v3463_v10 }
 0x307   : > { %2136 = vst.msk [vmem:[%s3488_s11 + $0x1e] sm:$0x1] %vm708_vm12, %v2128_v5  ;;  %v2838_v19 = vpop.f32.mrf.mxu1  ;;  %s2661_s13 = sshll.u32 %s3015_s21, 9  ;;  %s2406_s16 = sshll.u32 %s3488_s11, 4  ;;  %s3679_s16 = int_to_ptr.vmem [resolvable:$true] %s2406_s16 }
 0x308   : > { %v2344_v6 = vcombine.high %v2343_v45, %v2343_v45  ;;  %v2351_v7 = vrot.slane %v2343_v45, %v3463_v10  ;;  %s3677_s29 = scalar_lea.hbm %s3734_s5, %s2661_s13  ;;  %s2375_s21 = scalar_lea.sflag [#allocation5], %s3458_s7 }
 0x309   : > { %s2943_s8 = scalar_lea.vmem %s3679_s16, 512  ;;  %s3036_s9 = smov [#allocation4]  }
 0x30a   : > { %v2358_v8 = vrot.slane %v2344_v6, %v3463_v10  ;;  %v2359_v11 = vcombine.high %v2351_v7, %v2351_v7  ;;  %2365 = vst.msk [vmem:[%s3488_s11 + $0x7] sm:$0x1] %vm708_vm12, %v2351_v7  ;;  %p2944_p0 = scmp.ne.s32.totalorder %s3679_s16, %s2943_s8  ;;  %s2947_s10 = sshll.u32 %s3036_s9, 4  ;;  %s2948_s10 = int_to_ptr.vmem [resolvable:$false] %s2947_s10 }
 0x30b   : > { %s2949_s12 = scalar_lea.vmem %s2948_s10, 1024  ;;  %p2950_p3 = scmp.lt.s32.totalorder %s3679_s16, %s2948_s10 }
 0x30c   : > { %v2360_v12 = vcombine.high %v2358_v8, %v2358_v8  ;;  %2366 = vst.msk [vmem:[%s3488_s11 + $0xf] sm:$0x1] %vm708_vm12, %v2358_v8  ;;  %2367 = vst.msk [vmem:[%s3488_s11 + $0x17] sm:$0x1] %vm708_vm12, %v2359_v11  ;;  %p2945_p1 = pnand %p2944_p0, %p3107_p4  ;;  %p2951_p5 = scmp.lt.s32.totalorder %s2949_s12, %s2943_s8 }
 0x30e   : > { %2368 = vst.msk [vmem:[%s3488_s11 + $0x1f] sm:$0x1] %vm708_vm12, %v2360_v12  ;;  %p2946_p2 = pneg %p2945_p1  ;;  %p2952_p6 = por %p2951_p5, %p2950_p3 }
 0x310   : > { %p2953_p7 = pnand %p2952_p6, %p2946_p2 }
 0x312   : > { %2956 = shalt.err (!%p2953_p7)
}
 0x313   : > { %s2957_s11 = scalar_lea.hbm %s3677_s29, 512  ;;  %s2961_s15 = scalar_lea.hbm %s3734_s5, 1024 }
 0x314   : > { %p2958_p9 = scmp.ne.s32.totalorder %s3677_s29, %s2957_s11  ;;  %p2962_p12 = scmp.lt.s32.totalorder %s3677_s29, %s3734_s5 }
 0x315   : > { %p2963_p13 = scmp.lt.s32.totalorder %s2961_s15, %s2957_s11 }
 0x316   : > { %p2959_p10 = pnand %p2958_p9, %p3107_p4 }
 0x317   : > { %p2964_p0 = por %p2963_p13, %p2962_p12 }
 0x318   : > { %p2960_p11 = pneg %p2959_p10 }
 0x31a   : > { %p2965_p1 = pnand %p2964_p0, %p2960_p11 }
 0x31c   : > { %2968 = shalt.err (!%p2965_p1)
}
 0x31d   : > { %2842 = dma.vmem_to_hbm [thread:$0]  (%p3107_p4), %s3679_s16, 512, %s3677_s29, %s2375_s21, %s3034_s24, %s3034_s24, %s3035_s25  }
 0x31e PF: > { %p2852_p2 = scmp.ge.s32.totalorder %s3023_s23, 2  ;;  %s2421_s27 = sand.u32 1, %s3003_s18  }
 0x31f   : > { %s2422_s8 = scalar_lea.sflag [#allocation3], %s2421_s27 }
 0x320   : > { %p2846_p3 = pnand %p2852_p2, %p3114_p8 }
 0x322   : > { %p2847_p5 = pneg %p2846_p3 }
 0x324   : > { %2994 = dma.done.wait (%p2847_p5), %s2422_s8, 384  }
 0x325   : > { %2996 = vsyncadd (%p2847_p5), %s2422_s8, 4294966912  ;;  %s2431_s9 = scalar_lea.sflag [#allocation5], %s2421_s27 }
 0x326   : > { %2998 = dma.done.wait (%p2847_p5), %s2431_s9, 512  }
 0x327   : > { %3000 = vsyncadd (%p2847_p5), %s2431_s9, 4294966784  ;;  %s22_s23 = sadd.s32 1, %s3023_s23   ;;  %s3737_s18 = smov %s3007_s19 }
 0x328   : > { %p19_p6 = scmp.ge.s32.totalorder %s22_s23, 4   ;;  %s3738_s19 = smov %s3011_s20 }
 0x329   : > { %s3739_s20 = smov %s3120_s6  ;;  %s3740_s21 = smov %s3019_s22 }
 0x32a   : > { %s3741_s22 = smov %s3743_s26  ;;  %21 = sbr.rel (!%p19_p6) target bundleno = 6 (0x6), region = 97 }
 0x32f   :  { %2436 = vsyncpa [#allocation3], 1 }
 0x330   :  { %2438 = vsyncpa [#allocation3 + $0x1], 1 }
 0x331   :  { %2439 = vsyncpa [#allocation5], 1 }
 0x332   :  { %2441 = vsyncpa [#allocation5 + $0x1], 1 }

</bundles_post_ra>
